<compile_context>
chip_gen: v7x
topology: tpu7x:2x2x1
jax: 0.10.0
libtpu: 0.0.40
codegen_flags: <defaults>
</compile_context>

<pallas_src>
import jax
import jax.numpy as jnp
from jax.experimental import pallas as pl
from jax.experimental.pallas import tpu as pltpu

NDF = 16
C1 = NDF * 8        # 128 conv1 output channels
C2 = NDF * 16       # 256 conv2 output channels
LRELU_SLOPE = 0.2
BN_EPS = 1e-5

_VMEM = pl.BlockSpec(memory_space=pltpu.MemorySpace.VMEM)


# --------------------------------------------------------------------------
# Fused Pallas kernel: conv1 + LReLU + conv2 + BN + LReLU + conv3 + sigmoid
# --------------------------------------------------------------------------
def _disc16_fused_kernel(p_ref, w1_ref, w2_ref, g_ref, b_ref, w3_ref, o_ref):
    # p:   (16*N*16, 48) bf16  conv1 im2col patches, row order (tap, n, oh, ow)
    # w1:  (48, 128)     bf16  conv1 weight, (kh, kw, C_in) x C_out
    # w2:  (16, 128, 256) bf16 conv2 weight, one (C1, C2) slab per (kh, kw) tap
    # g,b: (1, 256)      f32   BatchNorm affine params
    # w3:  (16, 256)     f32   conv3 weight in (kh*4+kw, C_in) order
    # o:   (N, 1)        f32   sigmoid(conv3)
    n = o_ref.shape[0]
    nt = n * 16                      # rows per tap == N * H2 * W2 (H2 = W2 = 4)

    # ---- conv1 (3->128, k4 s2 p1) at all 16 tap positions + LeakyReLU -------------
    # Zero patch rows (conv2's padding ring) stay exactly zero: LeakyReLU(0 @ W1) == 0.
    a = jnp.dot(p_ref[...], w1_ref[...], preferred_element_type=jnp.float32)
    a = jnp.maximum(a, LRELU_SLOPE * a).astype(jnp.bfloat16)    # (16*N*16, 128)
    a = a.reshape(16, nt, C1)        # leading-dim split only (nt is a multiple of 16)

    # ---- conv2 (128->256, k4 s2 p1) as a sum of 16 tap matmuls, f32 accumulation --
    y = jnp.dot(a[0], w2_ref[0], preferred_element_type=jnp.float32)
    for t in range(1, 16):
        y = y + jnp.dot(a[t], w2_ref[t], preferred_element_type=jnp.float32)
    # y: (N*16, 256), rows ordered (n, oh, ow)

    # ---- BatchNorm2d (training-mode batch stats, centered two-pass variance) ------
    inv_rows = 1.0 / nt
    mean = jnp.sum(y, axis=0, keepdims=True) * inv_rows           # (1, 256)
    d = y - mean
    var = jnp.sum(d * d, axis=0, keepdims=True) * inv_rows        # biased var (PyTorch norm)
    z = d * (g_ref[...] * jax.lax.rsqrt(var + BN_EPS)) + b_ref[...]
    act = jnp.maximum(z, LRELU_SLOPE * z)                         # LeakyReLU(0.2)

    # ---- conv3 (256->1, k4 valid) + Sigmoid ----------------------------------------
    # conv3's 4x4 patch of sample m is exactly rows [16m, 16m+16) of `act`, so it is a
    # broadcast multiply with w3 plus two reductions (never a width-1 MXU column).
    t3 = act.reshape(n, 16, C2) * w3_ref[...][None, :, :]          # (N, 16, 256)
    s = jnp.sum(t3, axis=1)                                        # (N, 256)
    logits = jnp.sum(s, axis=1, keepdims=True)                     # (N, 1)
    # sigmoid(x) = 0.5*(tanh(x/2)+1): EUP op, numerically stable.
    o_ref[...] = 0.5 * (jnp.tanh(0.5 * logits) + 1.0)


# --------------------------------------------------------------------------
# Plain-JAX glue: patch construction (pad/slice/stack only) + one-time weight prep
# --------------------------------------------------------------------------
def _im2col_nhwc(x, k, stride, pad):
    """x: (N, H, W, C) -> patches (N, H_out, W_out, k*k*C), (kh, kw, C) minor order."""
    n, h, w, c = x.shape
    xp = jnp.pad(x, ((0, 0), (pad, pad), (pad, pad), (0, 0)))
    h_out = (h + 2 * pad - k) // stride + 1
    w_out = (w + 2 * pad - k) // stride + 1
    cols = []
    for i in range(k):
        for j in range(k):
            cols.append(xp[:, i:i + stride * h_out:stride,
                              j:j + stride * w_out:stride, :])
    return jnp.concatenate(cols, axis=-1), h_out, w_out


def _conv2_tap_patches(x_nhwc):
    """For each conv2 tap (kh, kw), the conv1 im2col patch of every conv1-output
    position that tap reads; all-zero rows where the tap lands on conv2's zero padding
    (LeakyReLU(0 @ W1) == 0 reproduces the padding exactly).
    Returns (16 * N * 16, 48) with rows ordered (tap, n, oh, ow)."""
    n = x_nhwc.shape[0]
    p_full, h1, w1 = _im2col_nhwc(x_nhwc, 4, 2, 1)                 # (N, 8, 8, 48)
    p_pad = jnp.pad(p_full, ((0, 0), (1, 1), (1, 1), (0, 0)))      # (N, 10, 10, 48)
    taps = [p_pad[:, kh:kh + 8:2, kw:kw + 8:2, :]                  # (N, 4, 4, 48)
            for kh in range(4) for kw in range(4)]
    p = jnp.stack(taps, axis=0)                                    # (16, N, 4, 4, 48)
    return p.reshape(16 * n * 16, 4 * 4 * 3)


def prepare_params(params):
    """One-time weight flatten / transpose / cast (outside the per-call path)."""
    w1m = jnp.transpose(params["w1"], (2, 3, 1, 0)).reshape(48, C1)        # (48, 128)
    w2t = jnp.transpose(params["w2"], (2, 3, 1, 0)).reshape(16, C1, C2)    # (16, 128, 256)
    w3r = jnp.transpose(params["w3"], (2, 3, 1, 0)).reshape(16, C2)        # (16, 256)
    return {
        "w1m": w1m.astype(jnp.bfloat16),
        "w2t": w2t.astype(jnp.bfloat16),
        "w3r": w3r.astype(jnp.float32),
        "gamma": params["gamma"].reshape(1, C2).astype(jnp.float32),
        "beta": params["beta"].reshape(1, C2).astype(jnp.float32),
    }


# --------------------------------------------------------------------------
# Full forward pass (single fused pallas_call)
# --------------------------------------------------------------------------
def dc_discriminator16_forward(x, prep):
    n = x.shape[0]
    x_nhwc = jnp.transpose(x, (0, 2, 3, 1))                        # NCHW -> NHWC, once
    p = _conv2_tap_patches(x_nhwc).astype(jnp.bfloat16)            # (16*N*16, 48)

    out = pl.pallas_call(
        _disc16_fused_kernel,
        out_shape=jax.ShapeDtypeStruct((n, 1), jnp.float32),
        in_specs=[_VMEM] * 6,
        out_specs=_VMEM,
        compiler_params=pltpu.CompilerParams(vmem_limit_bytes=32 * 1024 * 1024),
    )(p, prep["w1m"], prep["w2t"], prep["gamma"], prep["beta"], prep["w3r"])

    # matches PyTorch output after .squeeze(-1).squeeze(-1): shape (N, 1)
    return out


# --------------------------------------------------------------------------
# Pure-JAX reference (f32, lax.conv) for a sanity check
# --------------------------------------------------------------------------
def _reference_forward(x, params):
    dn = ("NCHW", "OIHW", "NCHW")
    y = jax.lax.conv_general_dilated(x, params["w1"], (2, 2), [(1, 1), (1, 1)],
                                     dimension_numbers=dn)
    y = jnp.where(y > 0, y, LRELU_SLOPE * y)
    y = jax.lax.conv_general_dilated(y, params["w2"], (2, 2), [(1, 1), (1, 1)],
                                     dimension_numbers=dn)
    mean = jnp.mean(y, axis=(0, 2, 3), keepdims=True)
    var = jnp.mean((y - mean) ** 2, axis=(0, 2, 3), keepdims=True)
    y = (y - mean) * jax.lax.rsqrt(var + BN_EPS)
    y = y * params["gamma"].reshape(1, -1, 1, 1) + params["beta"].reshape(1, -1, 1, 1)
    y = jnp.where(y > 0, y, LRELU_SLOPE * y)
    y = jax.lax.conv_general_dilated(y, params["w3"], (1, 1), [(0, 0), (0, 0)],
                                     dimension_numbers=dn)
    return jax.nn.sigmoid(y).reshape(x.shape[0], 1)


def init_params(key):
    k1, k2, k3 = jax.random.split(key, 3)
    return {
        # DCGAN-style deterministic init: conv weights ~ N(0, 0.02); PyTorch layouts.
        "w1": 0.02 * jax.random.normal(k1, (C1, 3, 4, 4), jnp.float32),
        "w2": 0.02 * jax.random.normal(k2, (C2, C1, 4, 4), jnp.float32),
        "w3": 0.02 * jax.random.normal(k3, (1, C2, 4, 4), jnp.float32),
        "gamma": jnp.ones((C2,), jnp.float32),
        "beta": jnp.zeros((C2,), jnp.float32),
    }


if __name__ == "__main__":
    key = jax.random.PRNGKey(0)
    pkey, xkey = jax.random.split(key)
    params = init_params(pkey)
    prep = prepare_params(params)          # one-time weight preprocessing (outside jit)

    # Input consistent with the 16x16 DCGAN discriminator: (N=2, C=3, H=16, W=16)
    x = jax.random.normal(xkey, (2, 3, 16, 16), jnp.float32)

    fwd = jax.jit(dc_discriminator16_forward)
    out = jax.block_until_ready(fwd(x, prep))
    assert out.shape == (2, 1), out.shape
    assert bool(jnp.all(jnp.isfinite(out)))

    ref = _reference_forward(x, params)
    assert bool(jnp.max(jnp.abs(out - ref)) < 3e-2), (out, ref)
    print("KERNEL_OK")
</pallas_src>

<mosaic_0001>
module attributes {stable_mosaic.version = 11 : i64} {
  func.func @_disc16_fused_kernel(%arg0: memref<512x48xbf16, #tpu.memory_space<vmem>>, %arg1: memref<48x128xbf16, #tpu.memory_space<vmem>>, %arg2: memref<16x128x256xbf16, #tpu.memory_space<vmem>>, %arg3: memref<1x256xf32, #tpu.memory_space<vmem>>, %arg4: memref<1x256xf32, #tpu.memory_space<vmem>>, %arg5: memref<16x256xf32, #tpu.memory_space<vmem>>, %arg6: memref<2x1xf32, #tpu.memory_space<vmem>>) attributes {dimension_semantics = [], scalar_prefetch = 0 : i64, scratch_operands = 0 : i64, tpu.core_type = #tpu.core_type<tc>} {
    %c0 = arith.constant 0 : index
    %c0_0 = arith.constant 0 : index
    %0 = vector.load %arg0[%c0, %c0_0] : memref<512x48xbf16, #tpu.memory_space<vmem>>, vector<512x48xbf16>
    %c0_1 = arith.constant 0 : index
    %c0_2 = arith.constant 0 : index
    %1 = vector.load %arg1[%c0_1, %c0_2] : memref<48x128xbf16, #tpu.memory_space<vmem>>, vector<48x128xbf16>
    %cst = arith.constant dense<0.000000e+00> : vector<512x128xf32>
    %2 = tpu.matmul %0, %1, %cst {dimension_numbers = #tpu.dot_dimension_numbers<[1], [0], [0], [1], [0, 0, 1, 1], [], []>} : vector<512x48xbf16>, vector<48x128xbf16>, vector<512x128xf32> -> vector<512x128xf32>
    %cst_3 = arith.constant 2.000000e-01 : f32
    %3 = vector.broadcast %cst_3 : f32 to vector<512x128xf32>
    %4 = arith.mulf %3, %2 : vector<512x128xf32>
    %5 = arith.maximumf %2, %4 : vector<512x128xf32>
    %6 = arith.truncf %5 : vector<512x128xf32> to vector<512x128xbf16>
    %7 = vector.shape_cast %6 : vector<512x128xbf16> to vector<16x32x128xbf16>
    %8 = vector.extract_strided_slice %7 {offsets = [0, 0, 0], sizes = [1, 32, 128], strides = [1, 1, 1]} : vector<16x32x128xbf16> to vector<1x32x128xbf16>
    %9 = vector.shape_cast %8 : vector<1x32x128xbf16> to vector<32x128xbf16>
    %c0_4 = arith.constant 0 : index
    %c0_5 = arith.constant 0 : index
    %c0_6 = arith.constant 0 : index
    %10 = vector.load %arg2[%c0_4, %c0_5, %c0_6] : memref<16x128x256xbf16, #tpu.memory_space<vmem>>, vector<1x128x256xbf16>
    %11 = vector.shape_cast %10 : vector<1x128x256xbf16> to vector<128x256xbf16>
    %cst_7 = arith.constant dense<0.000000e+00> : vector<32x256xf32>
    %12 = tpu.matmul %9, %11, %cst_7 {dimension_numbers = #tpu.dot_dimension_numbers<[1], [0], [0], [1], [0, 0, 1, 1], [], []>} : vector<32x128xbf16>, vector<128x256xbf16>, vector<32x256xf32> -> vector<32x256xf32>
    %13 = vector.extract_strided_slice %7 {offsets = [1, 0, 0], sizes = [1, 32, 128], strides = [1, 1, 1]} : vector<16x32x128xbf16> to vector<1x32x128xbf16>
    %14 = vector.shape_cast %13 : vector<1x32x128xbf16> to vector<32x128xbf16>
    %c1 = arith.constant 1 : index
    %c0_8 = arith.constant 0 : index
    %c0_9 = arith.constant 0 : index
    %15 = vector.load %arg2[%c1, %c0_8, %c0_9] : memref<16x128x256xbf16, #tpu.memory_space<vmem>>, vector<1x128x256xbf16>
    %16 = vector.shape_cast %15 : vector<1x128x256xbf16> to vector<128x256xbf16>
    %cst_10 = arith.constant dense<0.000000e+00> : vector<32x256xf32>
    %17 = tpu.matmul %14, %16, %cst_10 {dimension_numbers = #tpu.dot_dimension_numbers<[1], [0], [0], [1], [0, 0, 1, 1], [], []>} : vector<32x128xbf16>, vector<128x256xbf16>, vector<32x256xf32> -> vector<32x256xf32>
    %18 = arith.addf %12, %17 : vector<32x256xf32>
    %19 = vector.extract_strided_slice %7 {offsets = [2, 0, 0], sizes = [1, 32, 128], strides = [1, 1, 1]} : vector<16x32x128xbf16> to vector<1x32x128xbf16>
    %20 = vector.shape_cast %19 : vector<1x32x128xbf16> to vector<32x128xbf16>
    %c2 = arith.constant 2 : index
    %c0_11 = arith.constant 0 : index
    %c0_12 = arith.constant 0 : index
    %21 = vector.load %arg2[%c2, %c0_11, %c0_12] : memref<16x128x256xbf16, #tpu.memory_space<vmem>>, vector<1x128x256xbf16>
    %22 = vector.shape_cast %21 : vector<1x128x256xbf16> to vector<128x256xbf16>
    %cst_13 = arith.constant dense<0.000000e+00> : vector<32x256xf32>
    %23 = tpu.matmul %20, %22, %cst_13 {dimension_numbers = #tpu.dot_dimension_numbers<[1], [0], [0], [1], [0, 0, 1, 1], [], []>} : vector<32x128xbf16>, vector<128x256xbf16>, vector<32x256xf32> -> vector<32x256xf32>
    %24 = arith.addf %18, %23 : vector<32x256xf32>
    %25 = vector.extract_strided_slice %7 {offsets = [3, 0, 0], sizes = [1, 32, 128], strides = [1, 1, 1]} : vector<16x32x128xbf16> to vector<1x32x128xbf16>
    %26 = vector.shape_cast %25 : vector<1x32x128xbf16> to vector<32x128xbf16>
    %c3 = arith.constant 3 : index
    %c0_14 = arith.constant 0 : index
    %c0_15 = arith.constant 0 : index
    %27 = vector.load %arg2[%c3, %c0_14, %c0_15] : memref<16x128x256xbf16, #tpu.memory_space<vmem>>, vector<1x128x256xbf16>
    %28 = vector.shape_cast %27 : vector<1x128x256xbf16> to vector<128x256xbf16>
    %cst_16 = arith.constant dense<0.000000e+00> : vector<32x256xf32>
    %29 = tpu.matmul %26, %28, %cst_16 {dimension_numbers = #tpu.dot_dimension_numbers<[1], [0], [0], [1], [0, 0, 1, 1], [], []>} : vector<32x128xbf16>, vector<128x256xbf16>, vector<32x256xf32> -> vector<32x256xf32>
    %30 = arith.addf %24, %29 : vector<32x256xf32>
    %31 = vector.extract_strided_slice %7 {offsets = [4, 0, 0], sizes = [1, 32, 128], strides = [1, 1, 1]} : vector<16x32x128xbf16> to vector<1x32x128xbf16>
    %32 = vector.shape_cast %31 : vector<1x32x128xbf16> to vector<32x128xbf16>
    %c4 = arith.constant 4 : index
    %c0_17 = arith.constant 0 : index
    %c0_18 = arith.constant 0 : index
    %33 = vector.load %arg2[%c4, %c0_17, %c0_18] : memref<16x128x256xbf16, #tpu.memory_space<vmem>>, vector<1x128x256xbf16>
    %34 = vector.shape_cast %33 : vector<1x128x256xbf16> to vector<128x256xbf16>
    %cst_19 = arith.constant dense<0.000000e+00> : vector<32x256xf32>
    %35 = tpu.matmul %32, %34, %cst_19 {dimension_numbers = #tpu.dot_dimension_numbers<[1], [0], [0], [1], [0, 0, 1, 1], [], []>} : vector<32x128xbf16>, vector<128x256xbf16>, vector<32x256xf32> -> vector<32x256xf32>
    %36 = arith.addf %30, %35 : vector<32x256xf32>
    %37 = vector.extract_strided_slice %7 {offsets = [5, 0, 0], sizes = [1, 32, 128], strides = [1, 1, 1]} : vector<16x32x128xbf16> to vector<1x32x128xbf16>
    %38 = vector.shape_cast %37 : vector<1x32x128xbf16> to vector<32x128xbf16>
    %c5 = arith.constant 5 : index
    %c0_20 = arith.constant 0 : index
    %c0_21 = arith.constant 0 : index
    %39 = vector.load %arg2[%c5, %c0_20, %c0_21] : memref<16x128x256xbf16, #tpu.memory_space<vmem>>, vector<1x128x256xbf16>
    %40 = vector.shape_cast %39 : vector<1x128x256xbf16> to vector<128x256xbf16>
    %cst_22 = arith.constant dense<0.000000e+00> : vector<32x256xf32>
    %41 = tpu.matmul %38, %40, %cst_22 {dimension_numbers = #tpu.dot_dimension_numbers<[1], [0], [0], [1], [0, 0, 1, 1], [], []>} : vector<32x128xbf16>, vector<128x256xbf16>, vector<32x256xf32> -> vector<32x256xf32>
    %42 = arith.addf %36, %41 : vector<32x256xf32>
    %43 = vector.extract_strided_slice %7 {offsets = [6, 0, 0], sizes = [1, 32, 128], strides = [1, 1, 1]} : vector<16x32x128xbf16> to vector<1x32x128xbf16>
    %44 = vector.shape_cast %43 : vector<1x32x128xbf16> to vector<32x128xbf16>
    %c6 = arith.constant 6 : index
    %c0_23 = arith.constant 0 : index
    %c0_24 = arith.constant 0 : index
    %45 = vector.load %arg2[%c6, %c0_23, %c0_24] : memref<16x128x256xbf16, #tpu.memory_space<vmem>>, vector<1x128x256xbf16>
    %46 = vector.shape_cast %45 : vector<1x128x256xbf16> to vector<128x256xbf16>
    %cst_25 = arith.constant dense<0.000000e+00> : vector<32x256xf32>
    %47 = tpu.matmul %44, %46, %cst_25 {dimension_numbers = #tpu.dot_dimension_numbers<[1], [0], [0], [1], [0, 0, 1, 1], [], []>} : vector<32x128xbf16>, vector<128x256xbf16>, vector<32x256xf32> -> vector<32x256xf32>
    %48 = arith.addf %42, %47 : vector<32x256xf32>
    %49 = vector.extract_strided_slice %7 {offsets = [7, 0, 0], sizes = [1, 32, 128], strides = [1, 1, 1]} : vector<16x32x128xbf16> to vector<1x32x128xbf16>
    %50 = vector.shape_cast %49 : vector<1x32x128xbf16> to vector<32x128xbf16>
    %c7 = arith.constant 7 : index
    %c0_26 = arith.constant 0 : index
    %c0_27 = arith.constant 0 : index
    %51 = vector.load %arg2[%c7, %c0_26, %c0_27] : memref<16x128x256xbf16, #tpu.memory_space<vmem>>, vector<1x128x256xbf16>
    %52 = vector.shape_cast %51 : vector<1x128x256xbf16> to vector<128x256xbf16>
    %cst_28 = arith.constant dense<0.000000e+00> : vector<32x256xf32>
    %53 = tpu.matmul %50, %52, %cst_28 {dimension_numbers = #tpu.dot_dimension_numbers<[1], [0], [0], [1], [0, 0, 1, 1], [], []>} : vector<32x128xbf16>, vector<128x256xbf16>, vector<32x256xf32> -> vector<32x256xf32>
    %54 = arith.addf %48, %53 : vector<32x256xf32>
    %55 = vector.extract_strided_slice %7 {offsets = [8, 0, 0], sizes = [1, 32, 128], strides = [1, 1, 1]} : vector<16x32x128xbf16> to vector<1x32x128xbf16>
    %56 = vector.shape_cast %55 : vector<1x32x128xbf16> to vector<32x128xbf16>
    %c8 = arith.constant 8 : index
    %c0_29 = arith.constant 0 : index
    %c0_30 = arith.constant 0 : index
    %57 = vector.load %arg2[%c8, %c0_29, %c0_30] : memref<16x128x256xbf16, #tpu.memory_space<vmem>>, vector<1x128x256xbf16>
    %58 = vector.shape_cast %57 : vector<1x128x256xbf16> to vector<128x256xbf16>
    %cst_31 = arith.constant dense<0.000000e+00> : vector<32x256xf32>
    %59 = tpu.matmul %56, %58, %cst_31 {dimension_numbers = #tpu.dot_dimension_numbers<[1], [0], [0], [1], [0, 0, 1, 1], [], []>} : vector<32x128xbf16>, vector<128x256xbf16>, vector<32x256xf32> -> vector<32x256xf32>
    %60 = arith.addf %54, %59 : vector<32x256xf32>
    %61 = vector.extract_strided_slice %7 {offsets = [9, 0, 0], sizes = [1, 32, 128], strides = [1, 1, 1]} : vector<16x32x128xbf16> to vector<1x32x128xbf16>
    %62 = vector.shape_cast %61 : vector<1x32x128xbf16> to vector<32x128xbf16>
    %c9 = arith.constant 9 : index
    %c0_32 = arith.constant 0 : index
    %c0_33 = arith.constant 0 : index
    %63 = vector.load %arg2[%c9, %c0_32, %c0_33] : memref<16x128x256xbf16, #tpu.memory_space<vmem>>, vector<1x128x256xbf16>
    %64 = vector.shape_cast %63 : vector<1x128x256xbf16> to vector<128x256xbf16>
    %cst_34 = arith.constant dense<0.000000e+00> : vector<32x256xf32>
    %65 = tpu.matmul %62, %64, %cst_34 {dimension_numbers = #tpu.dot_dimension_numbers<[1], [0], [0], [1], [0, 0, 1, 1], [], []>} : vector<32x128xbf16>, vector<128x256xbf16>, vector<32x256xf32> -> vector<32x256xf32>
    %66 = arith.addf %60, %65 : vector<32x256xf32>
    %67 = vector.extract_strided_slice %7 {offsets = [10, 0, 0], sizes = [1, 32, 128], strides = [1, 1, 1]} : vector<16x32x128xbf16> to vector<1x32x128xbf16>
    %68 = vector.shape_cast %67 : vector<1x32x128xbf16> to vector<32x128xbf16>
    %c10 = arith.constant 10 : index
    %c0_35 = arith.constant 0 : index
    %c0_36 = arith.constant 0 : index
    %69 = vector.load %arg2[%c10, %c0_35, %c0_36] : memref<16x128x256xbf16, #tpu.memory_space<vmem>>, vector<1x128x256xbf16>
    %70 = vector.shape_cast %69 : vector<1x128x256xbf16> to vector<128x256xbf16>
    %cst_37 = arith.constant dense<0.000000e+00> : vector<32x256xf32>
    %71 = tpu.matmul %68, %70, %cst_37 {dimension_numbers = #tpu.dot_dimension_numbers<[1], [0], [0], [1], [0, 0, 1, 1], [], []>} : vector<32x128xbf16>, vector<128x256xbf16>, vector<32x256xf32> -> vector<32x256xf32>
    %72 = arith.addf %66, %71 : vector<32x256xf32>
    %73 = vector.extract_strided_slice %7 {offsets = [11, 0, 0], sizes = [1, 32, 128], strides = [1, 1, 1]} : vector<16x32x128xbf16> to vector<1x32x128xbf16>
    %74 = vector.shape_cast %73 : vector<1x32x128xbf16> to vector<32x128xbf16>
    %c11 = arith.constant 11 : index
    %c0_38 = arith.constant 0 : index
    %c0_39 = arith.constant 0 : index
    %75 = vector.load %arg2[%c11, %c0_38, %c0_39] : memref<16x128x256xbf16, #tpu.memory_space<vmem>>, vector<1x128x256xbf16>
    %76 = vector.shape_cast %75 : vector<1x128x256xbf16> to vector<128x256xbf16>
    %cst_40 = arith.constant dense<0.000000e+00> : vector<32x256xf32>
    %77 = tpu.matmul %74, %76, %cst_40 {dimension_numbers = #tpu.dot_dimension_numbers<[1], [0], [0], [1], [0, 0, 1, 1], [], []>} : vector<32x128xbf16>, vector<128x256xbf16>, vector<32x256xf32> -> vector<32x256xf32>
    %78 = arith.addf %72, %77 : vector<32x256xf32>
    %79 = vector.extract_strided_slice %7 {offsets = [12, 0, 0], sizes = [1, 32, 128], strides = [1, 1, 1]} : vector<16x32x128xbf16> to vector<1x32x128xbf16>
    %80 = vector.shape_cast %79 : vector<1x32x128xbf16> to vector<32x128xbf16>
    %c12 = arith.constant 12 : index
    %c0_41 = arith.constant 0 : index
    %c0_42 = arith.constant 0 : index
    %81 = vector.load %arg2[%c12, %c0_41, %c0_42] : memref<16x128x256xbf16, #tpu.memory_space<vmem>>, vector<1x128x256xbf16>
    %82 = vector.shape_cast %81 : vector<1x128x256xbf16> to vector<128x256xbf16>
    %cst_43 = arith.constant dense<0.000000e+00> : vector<32x256xf32>
    %83 = tpu.matmul %80, %82, %cst_43 {dimension_numbers = #tpu.dot_dimension_numbers<[1], [0], [0], [1], [0, 0, 1, 1], [], []>} : vector<32x128xbf16>, vector<128x256xbf16>, vector<32x256xf32> -> vector<32x256xf32>
    %84 = arith.addf %78, %83 : vector<32x256xf32>
    %85 = vector.extract_strided_slice %7 {offsets = [13, 0, 0], sizes = [1, 32, 128], strides = [1, 1, 1]} : vector<16x32x128xbf16> to vector<1x32x128xbf16>
    %86 = vector.shape_cast %85 : vector<1x32x128xbf16> to vector<32x128xbf16>
    %c13 = arith.constant 13 : index
    %c0_44 = arith.constant 0 : index
    %c0_45 = arith.constant 0 : index
    %87 = vector.load %arg2[%c13, %c0_44, %c0_45] : memref<16x128x256xbf16, #tpu.memory_space<vmem>>, vector<1x128x256xbf16>
    %88 = vector.shape_cast %87 : vector<1x128x256xbf16> to vector<128x256xbf16>
    %cst_46 = arith.constant dense<0.000000e+00> : vector<32x256xf32>
    %89 = tpu.matmul %86, %88, %cst_46 {dimension_numbers = #tpu.dot_dimension_numbers<[1], [0], [0], [1], [0, 0, 1, 1], [], []>} : vector<32x128xbf16>, vector<128x256xbf16>, vector<32x256xf32> -> vector<32x256xf32>
    %90 = arith.addf %84, %89 : vector<32x256xf32>
    %91 = vector.extract_strided_slice %7 {offsets = [14, 0, 0], sizes = [1, 32, 128], strides = [1, 1, 1]} : vector<16x32x128xbf16> to vector<1x32x128xbf16>
    %92 = vector.shape_cast %91 : vector<1x32x128xbf16> to vector<32x128xbf16>
    %c14 = arith.constant 14 : index
    %c0_47 = arith.constant 0 : index
    %c0_48 = arith.constant 0 : index
    %93 = vector.load %arg2[%c14, %c0_47, %c0_48] : memref<16x128x256xbf16, #tpu.memory_space<vmem>>, vector<1x128x256xbf16>
    %94 = vector.shape_cast %93 : vector<1x128x256xbf16> to vector<128x256xbf16>
    %cst_49 = arith.constant dense<0.000000e+00> : vector<32x256xf32>
    %95 = tpu.matmul %92, %94, %cst_49 {dimension_numbers = #tpu.dot_dimension_numbers<[1], [0], [0], [1], [0, 0, 1, 1], [], []>} : vector<32x128xbf16>, vector<128x256xbf16>, vector<32x256xf32> -> vector<32x256xf32>
    %96 = arith.addf %90, %95 : vector<32x256xf32>
    %97 = vector.extract_strided_slice %7 {offsets = [15, 0, 0], sizes = [1, 32, 128], strides = [1, 1, 1]} : vector<16x32x128xbf16> to vector<1x32x128xbf16>
    %98 = vector.shape_cast %97 : vector<1x32x128xbf16> to vector<32x128xbf16>
    %c15 = arith.constant 15 : index
    %c0_50 = arith.constant 0 : index
    %c0_51 = arith.constant 0 : index
    %99 = vector.load %arg2[%c15, %c0_50, %c0_51] : memref<16x128x256xbf16, #tpu.memory_space<vmem>>, vector<1x128x256xbf16>
    %100 = vector.shape_cast %99 : vector<1x128x256xbf16> to vector<128x256xbf16>
    %cst_52 = arith.constant dense<0.000000e+00> : vector<32x256xf32>
    %101 = tpu.matmul %98, %100, %cst_52 {dimension_numbers = #tpu.dot_dimension_numbers<[1], [0], [0], [1], [0, 0, 1, 1], [], []>} : vector<32x128xbf16>, vector<128x256xbf16>, vector<32x256xf32> -> vector<32x256xf32>
    %102 = arith.addf %96, %101 : vector<32x256xf32>
    %cst_53 = arith.constant dense<0.000000e+00> : vector<256xf32>
    %103 = vector.multi_reduction <add>, %102, %cst_53 [0] : vector<32x256xf32> to vector<256xf32>
    %104 = vector.shape_cast %103 : vector<256xf32> to vector<1x256xf32>
    %cst_54 = arith.constant 3.125000e-02 : f32
    %105 = vector.broadcast %cst_54 : f32 to vector<1x256xf32>
    %106 = arith.mulf %104, %105 : vector<1x256xf32>
    %107 = vector.broadcast %106 : vector<1x256xf32> to vector<32x256xf32>
    %108 = arith.subf %102, %107 : vector<32x256xf32>
    %109 = arith.mulf %108, %108 : vector<32x256xf32>
    %cst_55 = arith.constant dense<0.000000e+00> : vector<256xf32>
    %110 = vector.multi_reduction <add>, %109, %cst_55 [0] : vector<32x256xf32> to vector<256xf32>
    %111 = vector.shape_cast %110 : vector<256xf32> to vector<1x256xf32>
    %cst_56 = arith.constant 3.125000e-02 : f32
    %112 = vector.broadcast %cst_56 : f32 to vector<1x256xf32>
    %113 = arith.mulf %111, %112 : vector<1x256xf32>
    %c0_57 = arith.constant 0 : index
    %c0_58 = arith.constant 0 : index
    %114 = vector.load %arg3[%c0_57, %c0_58] : memref<1x256xf32, #tpu.memory_space<vmem>>, vector<1x256xf32>
    %cst_59 = arith.constant 9.99999974E-6 : f32
    %115 = vector.broadcast %cst_59 : f32 to vector<1x256xf32>
    %116 = arith.addf %113, %115 : vector<1x256xf32>
    %117 = math.rsqrt %116 : vector<1x256xf32>
    %118 = arith.mulf %114, %117 : vector<1x256xf32>
    %119 = vector.broadcast %118 : vector<1x256xf32> to vector<32x256xf32>
    %120 = arith.mulf %108, %119 : vector<32x256xf32>
    %c0_60 = arith.constant 0 : index
    %c0_61 = arith.constant 0 : index
    %121 = vector.load %arg4[%c0_60, %c0_61] : memref<1x256xf32, #tpu.memory_space<vmem>>, vector<1x256xf32>
    %122 = vector.broadcast %121 : vector<1x256xf32> to vector<32x256xf32>
    %123 = arith.addf %120, %122 : vector<32x256xf32>
    %cst_62 = arith.constant 2.000000e-01 : f32
    %124 = vector.broadcast %cst_62 : f32 to vector<32x256xf32>
    %125 = arith.mulf %124, %123 : vector<32x256xf32>
    %126 = arith.maximumf %123, %125 : vector<32x256xf32>
    %127 = vector.shape_cast %126 : vector<32x256xf32> to vector<2x16x256xf32>
    %c0_63 = arith.constant 0 : index
    %c0_64 = arith.constant 0 : index
    %128 = vector.load %arg5[%c0_63, %c0_64] : memref<16x256xf32, #tpu.memory_space<vmem>>, vector<16x256xf32>
    %129 = vector.shape_cast %128 : vector<16x256xf32> to vector<1x16x256xf32>
    %130 = vector.broadcast %129 : vector<1x16x256xf32> to vector<2x16x256xf32>
    %131 = arith.mulf %127, %130 : vector<2x16x256xf32>
    %cst_65 = arith.constant dense<0.000000e+00> : vector<2x256xf32>
    %132 = vector.multi_reduction <add>, %131, %cst_65 [1] : vector<2x16x256xf32> to vector<2x256xf32>
    %cst_66 = arith.constant dense<0.000000e+00> : vector<2xf32>
    %133 = vector.multi_reduction <add>, %132, %cst_66 [1] : vector<2x256xf32> to vector<2xf32>
    %134 = vector.shape_cast %133 : vector<2xf32> to vector<2x1xf32>
    %cst_67 = arith.constant 5.000000e-01 : f32
    %135 = vector.broadcast %cst_67 : f32 to vector<2x1xf32>
    %136 = arith.mulf %135, %134 : vector<2x1xf32>
    %137 = math.tanh %136 : vector<2x1xf32>
    %cst_68 = arith.constant 1.000000e+00 : f32
    %138 = vector.broadcast %cst_68 : f32 to vector<2x1xf32>
    %139 = arith.addf %137, %138 : vector<2x1xf32>
    %cst_69 = arith.constant 5.000000e-01 : f32
    %140 = vector.broadcast %cst_69 : f32 to vector<2x1xf32>
    %141 = arith.mulf %140, %139 : vector<2x1xf32>
    %c0_70 = arith.constant 0 : index
    %c0_71 = arith.constant 0 : index
    %142 = vector.load %arg6[%c0_70, %c0_71] : memref<2x1xf32, #tpu.memory_space<vmem>>, vector<2x1xf32>
    tpu.vector_store %arg6[%c0_70, %c0_71], %141 {strides = array<i32>} : memref<2x1xf32, #tpu.memory_space<vmem>>, vector<2x1xf32>,
    return
  }
}

</mosaic_0001>

<bundles_post_ra>
// kernel: dc_discriminator16_forward.1
= control target key start
LH: loop header
LB: loop body
LE: loop exit
PB: predicated region body
PF: predicated region fallthrough
CT: control target
= control target key end

     0   :  { %vm272_vm0 = vcmask 392192   ;;  %v4744_v49 = vmov 0   ;;  %vm3508_vm1 = vcmask 1041409   ;;  %vm3513_vm2 = vcmask 1041408   ;;  %s5843_s1 = inlined_call_operand.vmem [shape: bf16[48,128], index: 1, kind: input, shape index: {}]   ;;  %s5844_s0 = inlined_call_operand.vmem [shape: bf16[512,48], index: 0, kind: input, shape index: {}]   ;;  %s5845_s2 = inlined_call_operand.vmem [shape: bf16[16,128,256], index: 2, kind: input, shape index: {}]   ;;  %s5846_s3 = inlined_call_operand.vmem [shape: f32[1,256], index: 3, kind: input, shape index: {}]   ;;  %s5847_s4 = inlined_call_operand.vmem [shape: f32[1,256], index: 4, kind: input, shape index: {}]   ;;  %s5848_s5 = inlined_call_operand.vmem [shape: f32[16,256], index: 5, kind: input, shape index: {}]   ;;  %s5849_s6 = inlined_call_operand.vmem [shape: f32[2,1], index: 6, kind: output, shape index: {}]  }
   0x1   :  { %v4319_v0 = vld [vmem:[%s5843_s1] sm:$0xff]   ;;  %v4320_v1 = vld [vmem:[%s5843_s1 + $0x8] sm:$0xff]   ;;  %v4321_v3 = vld [vmem:[%s5843_s1 + $0x10] sm:$0xff]   ;;  %1878 = vmatprep.mubr.bf16.mxu1 %v4744_v49  ;;  %vm3523_vm3 = vcmask 1024  }
   0x2   :  { %4127 = vmatprep.subr.bf16.mxu0 %v4319_v0  ;;  %v4322_v2 = vld [vmem:[%s5844_s0] sm:$0xff]   ;;  %v4323_v4 = vld [vmem:[%s5844_s0 + $0x8] sm:$0xff]   ;;  %v4324_v5 = vld [vmem:[%s5844_s0 + $0x10] sm:$0xff]  }
   0x3   :  { %4128 = vmatpush3.bf16.msra.mxu0 %v4319_v0  ;;  %4133 = vmatprep.mubr.msk.bf16.mxu0 %vm272_vm0, %v4322_v2  ;;  %v4325_v6 = vld [vmem:[%s5844_s0 + $0x18] sm:$0xff]   ;;  %v4326_v7 = vld [vmem:[%s5844_s0 + $0x20] sm:$0xff]   ;;  %v4327_v8 = vld [vmem:[%s5844_s0 + $0x28] sm:$0xff]  }
   0x4   :  { %4129 = vmatprep.subr.bf16.mxu0 %v4320_v1  ;;  %v4328_v9 = vld [vmem:[%s5844_s0 + $0x30] sm:$0xff]   ;;  %v4347_v10 = vld [vmem:[%s5845_s2 + $0x80] ss:$8 sps:$4 sm:$0xff]   ;;  %v4349_v11 = vld [vmem:[%s5845_s2 + $0x84] ss:$8 sps:$4 sm:$0xff]  }
   0x5   :  { %v4353_v12 = vld [vmem:[%s5845_s2 + $0x94] ss:$8 sps:$4 sm:$0xff]   ;;  %v4351_v13 = vld [vmem:[%s5845_s2 + $0x90] ss:$8 sps:$4 sm:$0xff]   ;;  %v4357_v15 = vld [vmem:[%s5845_s2 + $0xa4] ss:$8 sps:$4 sm:$0xff]  }
   0x6   :  { %v4329_v14 = vld [vmem:[%s5844_s0 + $0x38] sm:$0xff]   ;;  %v4330_v16 = vld [vmem:[%s5844_s0 + $0x40] sm:$0xff]   ;;  %v4331_v20 = vld [vmem:[%s5844_s0 + $0x48] sm:$0xff]  }
   0x7   :  { %4130 = vmatpush3.bf16.msra.mxu0 %v4320_v1  ;;  %v4355_v17 = vld [vmem:[%s5845_s2 + $0xa0] ss:$8 sps:$4 sm:$0xff]   ;;  %v4361_v18 = vld [vmem:[%s5845_s2 + $0xb4] ss:$8 sps:$4 sm:$0xff]   ;;  %v4359_v19 = vld [vmem:[%s5845_s2 + $0xb0] ss:$8 sps:$4 sm:$0xff]  }
   0x8   :  { %4131 = vmatprep.subr.bf16.mxu0 %v4321_v3  ;;  %v4332_v21 = vld [vmem:[%s5844_s0 + $0x50] sm:$0xff]   ;;  %v4333_v22 = vld [vmem:[%s5844_s0 + $0x58] sm:$0xff]   ;;  %v4334_v23 = vld [vmem:[%s5844_s0 + $0x60] sm:$0xff]  }
   0x9   :  { %v4335_v24 = vld [vmem:[%s5844_s0 + $0x68] sm:$0xff]   ;;  %v4336_v25 = vld [vmem:[%s5844_s0 + $0x70] sm:$0xff]   ;;  %v4337_v26 = vld [vmem:[%s5844_s0 + $0x78] sm:$0xff]  }
   0xa   :  { %v4338_v27 = vld [vmem:[%s5844_s0 + $0x80] sm:$0xff]   ;;  %v4339_v28 = vld [vmem:[%s5844_s0 + $0x88] sm:$0xff]   ;;  %v4340_v29 = vld [vmem:[%s5844_s0 + $0x90] sm:$0xff]  }
   0xb   :  { %4132 = vmatpush3.bf16.msra.mxu0 %v4321_v3  ;;  %v4341_v30 = vld [vmem:[%s5844_s0 + $0x98] sm:$0xff]   ;;  %v4342_v31 = vld [vmem:[%s5844_s0 + $0xa0] sm:$0xff]   ;;  %v4343_v32 = vld [vmem:[%s5844_s0 + $0xa8] sm:$0xff]  }
   0xc   :  { %931 = vmatprep.subr.bf16.mxu0 %v4349_v11  ;;  %v4344_v33 = vld [vmem:[%s5844_s0 + $0xb0] sm:$0xff]   ;;  %v4345_v34 = vld [vmem:[%s5844_s0 + $0xb8] sm:$0xff]   ;;  %v4365_v35 = vld [vmem:[%s5845_s2 + $0xc4] ss:$8 sps:$4 sm:$0xff]  }
   0xd   :  { %v4346_v36 = vld [vmem:[%s5844_s0 + $0xc0] sm:$0xff]   ;;  %v4369_v38 = vld [vmem:[%s5845_s2 + $0xd4] ss:$8 sps:$4 sm:$0xff]   ;;  %v4367_v39 = vld [vmem:[%s5845_s2 + $0xd0] ss:$8 sps:$4 sm:$0xff]  }
   0xe   :  { %4134 = vmatmul.mubr.msk.bf16.vlgmr.msra.gmra.mrb[0].mxu0 %vm272_vm0, %v4323_v4  ;;  %v4363_v37 = vld [vmem:[%s5845_s2 + $0xc0] ss:$8 sps:$4 sm:$0xff]   ;;  %v4373_v41 = vld [vmem:[%s5845_s2 + $0xe4] ss:$8 sps:$4 sm:$0xff]   ;;  %v4354_v42 = vld [vmem:[%s5844_s0 + $0xd0] sm:$0xff]  }
   0xf   :  { %4137 = vmatprep.mubr.msk.bf16.mxu0 %vm272_vm0, %v4324_v5  ;;  %932 = vmatpush1.bf16.msra.mxu0 %v4347_v10  ;;  %v4350_v40 = vld [vmem:[%s5844_s0 + $0xc8] sm:$0xff]   ;;  %v4377_v44 = vld [vmem:[%s5845_s2 + $0xf4] ss:$8 sps:$4 sm:$0xff]   ;;  %v4375_v45 = vld [vmem:[%s5845_s2 + $0xf0] ss:$8 sps:$4 sm:$0xff]  }
  0x10   :  { %933 = vmatprep.subr.bf16.mxu0 %v4353_v12  ;;  %v4371_v43 = vld [vmem:[%s5845_s2 + $0xe0] ss:$8 sps:$4 sm:$0xff]   ;;  %v4358_v46 = vld [vmem:[%s5844_s0 + $0xd8] sm:$0xff]   ;;  %v4380_v47 = vld [vmem:[%s5845_s2 + $0x4] ss:$8 sps:$4 sm:$0xff]  }
  0x11   :  { %v4362_v48 = vld [vmem:[%s5844_s0 + $0xe0] sm:$0xff]   ;;  %v4366_v50 = vld [vmem:[%s5844_s0 + $0xe8] sm:$0xff]   ;;  %v4370_v52 = vld [vmem:[%s5844_s0 + $0xf0] sm:$0xff]  }
  0x12   :  { %v4387_v51 = vld [vmem:[%s5845_s2 + $0x304] ss:$8 sps:$4 sm:$0xff]   ;;  %v4389_v53 = vld [vmem:[%s5845_s2 + $0x300] ss:$8 sps:$4 sm:$0xff]   ;;  %v4393_v54 = vld [vmem:[%s5845_s2 + $0x314] ss:$8 sps:$4 sm:$0xff]  }
  0x13   :  { %934 = vmatpush1.bf16.msra.mxu0 %v4351_v13  ;;  %1846 = vmatprep.subr.bf16.mxu1 %v4387_v51  ;;  %v4395_v55 = vld [vmem:[%s5845_s2 + $0x310] ss:$8 sps:$4 sm:$0xff]   ;;  %v4399_v56 = vld [vmem:[%s5845_s2 + $0x324] ss:$8 sps:$4 sm:$0xff]   ;;  %v4401_v58 = vld [vmem:[%s5845_s2 + $0x320] ss:$8 sps:$4 sm:$0xff]  }
  0x14   :  { %935 = vmatprep.subr.bf16.mxu0 %v4357_v15  ;;  %1847 = vmatpush1.bf16.msra.mxu1 %v4389_v53  ;;  %v4374_v57 = vld [vmem:[%s5844_s0 + $0xf8] sm:$0xff]   ;;  %v4411_v61 = vld [vmem:[%s5845_s2 + $0x344] ss:$8 sps:$4 sm:$0xff]   ;;  %v4413_v62 = vld [vmem:[%s5845_s2 + $0x340] ss:$8 sps:$4 sm:$0xff]  }
  0x15   :  { %1848 = vmatprep.subr.bf16.mxu1 %v4393_v54  ;;  %v4405_v59 = vld [vmem:[%s5845_s2 + $0x334] ss:$8 sps:$4 sm:$0xff]   ;;  %v4407_v60 = vld [vmem:[%s5845_s2 + $0x330] ss:$8 sps:$4 sm:$0xff]   ;;  %v4423_v1 = vld [vmem:[%s5845_s2 + $0x364] ss:$8 sps:$4 sm:$0xff]  }
  0x16   :  { %4138 = vmatmul.mubr.msk.bf16.gmra.mrb[4].mxu0 %vm272_vm0, %v4325_v6  ;;  %v4417_v63 = vld [vmem:[%s5845_s2 + $0x354] ss:$8 sps:$4 sm:$0xff]   ;;  %v4419_v0 = vld [vmem:[%s5845_s2 + $0x350] ss:$8 sps:$4 sm:$0xff]   ;;  %v4425_v2 = vld [vmem:[%s5845_s2 + $0x360] ss:$8 sps:$4 sm:$0xff]  }
  0x17   :  { %4141 = vmatprep.mubr.msk.bf16.mxu0 %vm272_vm0, %v4326_v7  ;;  %936 = vmatpush1.bf16.msra.mxu0 %v4355_v17  ;;  %v4429_v3 = vld [vmem:[%s5845_s2 + $0x374] ss:$8 sps:$4 sm:$0xff]   ;;  %v4431_v4 = vld [vmem:[%s5845_s2 + $0x370] ss:$8 sps:$4 sm:$0xff]   ;;  %v4437_v5 = vld [vmem:[%s5845_s2 + $0x384] ss:$8 sps:$4 sm:$0xff]  }
  0x18   :  { %937 = vmatprep.subr.bf16.mxu0 %v4361_v18  ;;  %1849 = vmatpush1.bf16.msra.mxu1 %v4395_v55  ;;  %v4392_v55 = vld [vmem:[%s5845_s2 + $0x34] ss:$8 sps:$4 sm:$0xff]  }
  0x19   :  { %1850 = vmatprep.subr.bf16.mxu1 %v4399_v56 }
  0x1b   :  { %938 = vmatpush1.bf16.msra.mxu0 %v4359_v19 }
  0x1c   :  { %939 = vmatprep.subr.bf16.mxu0 %v4365_v35  ;;  %1851 = vmatpush1.bf16.msra.mxu1 %v4401_v58 }
  0x1d   :  { %1852 = vmatprep.subr.bf16.mxu1 %v4405_v59 }
  0x1e   :  { %4142 = vmatmul.mubr.msk.bf16.gmra.mrb[8].mxu0 %vm272_vm0, %v4327_v8 }
  0x1f   :  { %4145 = vmatprep.mubr.msk.bf16.mxu0 %vm272_vm0, %v4328_v9  ;;  %940 = vmatpush1.bf16.msra.mxu0 %v4363_v37 }
  0x20   :  { %941 = vmatprep.subr.bf16.mxu0 %v4369_v38  ;;  %1853 = vmatpush1.bf16.msra.mxu1 %v4407_v60 }
  0x21   :  { %1854 = vmatprep.subr.bf16.mxu1 %v4411_v61 }
  0x23   :  { %942 = vmatpush1.bf16.msra.mxu0 %v4367_v39 }
  0x24   :  { %943 = vmatprep.subr.bf16.mxu0 %v4373_v41  ;;  %1855 = vmatpush1.bf16.msra.mxu1 %v4413_v62  ;;  %v4390_v62 = vld [vmem:[%s5845_s2 + $0x30] ss:$8 sps:$4 sm:$0xff]  }
  0x25   :  { %1856 = vmatprep.subr.bf16.mxu1 %v4417_v63 }
  0x26   :  { %4146 = vmatmul.mubr.msk.bf16.gmra.mrb[12].mxu0 %vm272_vm0, %v4329_v14 }
  0x27   :  { %4149 = vmatprep.mubr.msk.bf16.mxu0 %vm272_vm0, %v4330_v16  ;;  %944 = vmatpush1.bf16.msra.mxu0 %v4371_v43  ;;  %v4381_v43 = vld [vmem:[%s5845_s2 + $0x10] ss:$8 sps:$4 sm:$0xff]  }
  0x28   :  { %945 = vmatprep.subr.bf16.mxu0 %v4377_v44  ;;  %1857 = vmatpush1.bf16.msra.mxu1 %v4419_v0  ;;  %v4398_v0 = vld [vmem:[%s5845_s2 + $0x44] ss:$8 sps:$4 sm:$0xff]  }
  0x29   :  { %1858 = vmatprep.subr.bf16.mxu1 %v4423_v1 }
  0x2b   :  { %946 = vmatpush1.bf16.msra.mxu0 %v4375_v45  ;;  %v4386_v45 = vld [vmem:[%s5845_s2 + $0x24] ss:$8 sps:$4 sm:$0xff]  }
  0x2c   :  { %1064 = vmatprep.subr.bf16.mxu0 %v4380_v47  ;;  %1859 = vmatpush1.bf16.msra.mxu1 %v4425_v2 }
  0x2d   :  { %1860 = vmatprep.subr.bf16.mxu1 %v4429_v3 }
  0x2e   :  { %4150 = vmatmul.mubr.msk.bf16.gmra.mrb[16].mxu0 %vm272_vm0, %v4331_v20 }
  0x2f   :  { %4153 = vmatprep.mubr.msk.bf16.mxu0 %vm272_vm0, %v4332_v21 }
  0x30   :  { %1861 = vmatpush1.bf16.msra.mxu1 %v4431_v4 }
  0x31   :  { %2004 = vmatprep.subr.bf16.mxu1 %v4437_v5 }
  0x36   :  { %4154 = vmatmul.mubr.msk.bf16.gmra.mrb[20].mxu0 %vm272_vm0, %v4333_v22 }
  0x37   :  { %4157 = vmatprep.mubr.msk.bf16.mxu0 %vm272_vm0, %v4334_v23 }
  0x3e   :  { %4158 = vmatmul.mubr.msk.bf16.gmra.mrb[24].mxu0 %vm272_vm0, %v4335_v24 }
  0x3f   :  { %4161 = vmatprep.mubr.msk.bf16.mxu0 %vm272_vm0, %v4336_v25 }
  0x46   :  { %4162 = vmatmul.mubr.msk.bf16.gmra.mrb[28].mxu0 %vm272_vm0, %v4337_v26 }
  0x47   :  { %4165 = vmatprep.mubr.msk.bf16.mxu0 %vm272_vm0, %v4338_v27 }
  0x4e   :  { %4166 = vmatmul.mubr.msk.bf16.gmra.mrb[32].mxu0 %vm272_vm0, %v4339_v28 }
  0x4f   :  { %4169 = vmatprep.mubr.msk.bf16.mxu0 %vm272_vm0, %v4340_v29 }
  0x56   :  { %4170 = vmatmul.mubr.msk.bf16.gmra.mrb[36].mxu0 %vm272_vm0, %v4341_v30 }
  0x57   :  { %4173 = vmatprep.mubr.msk.bf16.mxu0 %vm272_vm0, %v4342_v31 }
  0x5e   :  { %4174 = vmatmul.mubr.msk.bf16.gmra.mrb[40].mxu0 %vm272_vm0, %v4343_v32 }
  0x5f   :  { %4177 = vmatprep.mubr.msk.bf16.mxu0 %vm272_vm0, %v4344_v33  ;;  %v4378_v33 = vld [vmem:[%s5845_s2] ss:$8 sps:$4 sm:$0xff]  }
  0x66   :  { %4178 = vmatmul.mubr.msk.bf16.gmra.mrb[44].mxu0 %vm272_vm0, %v4345_v34 }
  0x67   :  { %4181 = vmatprep.mubr.msk.bf16.mxu0 %vm272_vm0, %v4346_v36  ;;  %v4383_v36 = vld [vmem:[%s5845_s2 + $0x14] ss:$8 sps:$4 sm:$0xff]  }
  0x6e   :  { %4182 = vmatmul.mubr.msk.bf16.gmra.mrb[48].mxu0 %vm272_vm0, %v4350_v40 }
  0x6f   :  { %4185 = vmatprep.mubr.msk.bf16.mxu0 %vm272_vm0, %v4354_v42 }
  0x76   :  { %4186 = vmatmul.mubr.msk.bf16.gmra.mrb[52].mxu0 %vm272_vm0, %v4358_v46 }
  0x77   :  { %4189 = vmatprep.mubr.msk.bf16.mxu0 %vm272_vm0, %v4362_v48 }
  0x7e   :  { %4190 = vmatmul.mubr.msk.bf16.gmra.mrb[56].mxu0 %vm272_vm0, %v4366_v50 }
  0x7f   :  { %4193 = vmatprep.mubr.msk.bf16.mxu0 %vm272_vm0, %v4370_v52  ;;  %v4384_v52 = vld [vmem:[%s5845_s2 + $0x20] ss:$8 sps:$4 sm:$0xff]  }
  0x86   :  { %4194 = vmatmul.mubr.msk.bf16.gmra.mrb[60].mxu0 %vm272_vm0, %v4374_v57 }
  0x87   :  { %963 = vmatprep.mubr.bf16.mxu0 %v4744_v49 }
  0xe1   :  { %v4135_v6 = vpop.f32.mrb[0].mxu0 }
  0xe2   :  { %v660_v7 = vmul.f32 0.2, %v4135_v6  ;;  %v403_v8 = vpop.f32.mrb[1].mxu0 }
  0xe3   :  { %v658_v9 = vmul.f32 0.2, %v403_v8  ;;  %v4136_v10 = vpop.f32.mrb[2].mxu0 }
  0xe4   :  { %v661_v11 = vmul.f32 0.2, %v4136_v10  ;;  %v406_v12 = vpop.f32.mrb[3].mxu0  ;;  %v724_v14 = vmax.f32 %v4135_v6, %v660_v7  ;;  %v4396_v6 = vld [vmem:[%s5845_s2 + $0x40] ss:$8 sps:$4 sm:$0xff]  }
  0xe5   :  { %v659_v13 = vmul.f32 0.2, %v406_v12  ;;  %v722_v16 = vmax.f32 %v403_v8, %v658_v9  ;;  %v4404_v9 = vld [vmem:[%s5845_s2 + $0x54] ss:$8 sps:$4 sm:$0xff]  }
  0xe6   :  { %v725_v15 = vmax.f32 %v4136_v10, %v661_v11 }
  0xe7   :  { %v723_v17 = vmax.f32 %v406_v12, %v659_v13 }
  0xe8   :  { %v5022_v18 = vpack.c.bf16 %v725_v15, %v724_v14 }
  0xe9   :  { %v5024_v19 = vpack.c.bf16 %v723_v17, %v722_v16  ;;  %v4139_v20 = vpop.f32.mrb[4].mxu0  ;;  %v4402_v16 = vld [vmem:[%s5845_s2 + $0x50] ss:$8 sps:$4 sm:$0xff]  }
  0xea   :  { %v664_v21 = vmul.f32 0.2, %v4139_v20  ;;  %v419_v22 = vpop.f32.mrb[5].mxu0 }
  0xeb   :  { %v662_v23 = vmul.f32 0.2, %v419_v22  ;;  %v4140_v24 = vpop.f32.mrb[6].mxu0 }
  0xec   :  { %v665_v25 = vmul.f32 0.2, %v4140_v24  ;;  %v422_v26 = vpop.f32.mrb[7].mxu0  ;;  %v728_v28 = vmax.f32 %v4139_v20, %v664_v21  ;;  %v4410_v20 = vld [vmem:[%s5845_s2 + $0x64] ss:$8 sps:$4 sm:$0xff]  }
  0xed   :  { %v663_v27 = vmul.f32 0.2, %v422_v26  ;;  %v726_v30 = vmax.f32 %v419_v22, %v662_v23 }
  0xee   :  { %v729_v29 = vmax.f32 %v4140_v24, %v665_v25 }
  0xef   :  { %v727_v31 = vmax.f32 %v422_v26, %v663_v27  ;;  %v4408_v26 = vld [vmem:[%s5845_s2 + $0x60] ss:$8 sps:$4 sm:$0xff]  }
  0xf0   :  { %v789_v32 = vpack.c.bf16 %v729_v29, %v728_v28  ;;  %v4416_v29 = vld [vmem:[%s5845_s2 + $0x74] ss:$8 sps:$4 sm:$0xff]  }
  0xf1   :  { %v788_v34 = vpack.c.bf16 %v727_v31, %v726_v30  ;;  %v4143_v35 = vpop.f32.mrb[8].mxu0 }
  0xf2   :  { %v668_v37 = vmul.f32 0.2, %v4143_v35  ;;  %v435_v38 = vpop.f32.mrb[9].mxu0 }
  0xf3   :  { %v666_v39 = vmul.f32 0.2, %v435_v38  ;;  %v4144_v40 = vpop.f32.mrb[10].mxu0  ;;  %964 = vmatmul.mubr.bf16.vlgmr.msra.gmra.mrb[64].mxu0 %v788_v34 }
  0xf4   :  { %v669_v41 = vmul.f32 0.2, %v4144_v40  ;;  %1065 = vmatpush1.bf16.msra.mxu0 %v4378_v33  ;;  %v438_v42 = vpop.f32.mrb[11].mxu0  ;;  %973 = vmatprep.mubr.bf16.mxu0 %v4744_v49  ;;  %v732_v46 = vmax.f32 %v4143_v35, %v668_v37 }
  0xf5   :  { %v667_v44 = vmul.f32 0.2, %v438_v42  ;;  %1066 = vmatprep.subr.bf16.mxu0 %v4383_v36  ;;  %v730_v48 = vmax.f32 %v435_v38, %v666_v39  ;;  %v4414_v36 = vld [vmem:[%s5845_s2 + $0x70] ss:$8 sps:$4 sm:$0xff]   ;;  %v4422_v38 = vld [vmem:[%s5845_s2 + $0x104] ss:$8 sps:$4 sm:$0xff]  }
  0xf6   :  { %v733_v47 = vmax.f32 %v4144_v40, %v669_v41 }
  0xf7   :  { %v731_v50 = vmax.f32 %v438_v42, %v667_v44  ;;  %v4420_v44 = vld [vmem:[%s5845_s2 + $0x100] ss:$8 sps:$4 sm:$0xff]  }
  0xf8   :  { %v5039_v51 = vpack.c.bf16 %v733_v47, %v732_v46  ;;  %1067 = vmatpush1.bf16.msra.mxu0 %v4381_v43  ;;  %v4428_v47 = vld [vmem:[%s5845_s2 + $0x114] ss:$8 sps:$4 sm:$0xff]  }
  0xf9   :  { %v5044_v53 = vpack.c.bf16 %v731_v50, %v730_v48  ;;  %v4147_v54 = vpop.f32.mrb[12].mxu0  ;;  %1068 = vmatprep.subr.bf16.mxu0 %v4386_v45 }
  0xfa   :  { %v672_v56 = vmul.f32 0.2, %v4147_v54  ;;  %v451_v57 = vpop.f32.mrb[13].mxu0 }
  0xfb   :  { %v670_v58 = vmul.f32 0.2, %v451_v57  ;;  %v4148_v59 = vpop.f32.mrb[14].mxu0  ;;  %974 = vmatmul.mubr.bf16.gmra.mrb[68].mxu0 %v789_v32 }
  0xfc   :  { %v673_v60 = vmul.f32 0.2, %v4148_v59  ;;  %1069 = vmatpush1.bf16.msra.mxu0 %v4384_v52  ;;  %v454_v61 = vpop.f32.mrb[15].mxu0  ;;  %1096 = vmatprep.mubr.bf16.mxu0 %v4744_v49  ;;  %v736_v1 = vmax.f32 %v4147_v54, %v672_v56 }
  0xfd   :  { %v671_v63 = vmul.f32 0.2, %v454_v61  ;;  %1070 = vmatprep.subr.bf16.mxu0 %v4392_v55  ;;  %v734_v3 = vmax.f32 %v451_v57, %v670_v58  ;;  %v4426_v57 = vld [vmem:[%s5845_s2 + $0x110] ss:$8 sps:$4 sm:$0xff]  }
  0xfe   :  { %v737_v2 = vmax.f32 %v4148_v59, %v673_v60  ;;  %v4434_v59 = vld [vmem:[%s5845_s2 + $0x124] ss:$8 sps:$4 sm:$0xff]  }
  0xff   :  { %v735_v4 = vmax.f32 %v454_v61, %v671_v63 }
 0x100   :  { %v5056_v5 = vpack.c.bf16 %v737_v2, %v736_v1  ;;  %1071 = vmatpush1.bf16.msra.mxu0 %v4390_v62  ;;  %v4435_v1 = vld [vmem:[%s5845_s2 + $0x380] ss:$8 sps:$4 sm:$0xff]  }
 0x101   :  { %v5061_v7 = vpack.c.bf16 %v735_v4, %v734_v3  ;;  %v4151_v8 = vpop.f32.mrb[16].mxu0  ;;  %1072 = vmatprep.subr.bf16.mxu0 %v4398_v0  ;;  %v4432_v0 = vld [vmem:[%s5845_s2 + $0x120] ss:$8 sps:$4 sm:$0xff]   ;;  %v4440_v3 = vld [vmem:[%s5845_s2 + $0x134] ss:$8 sps:$4 sm:$0xff]  }
 0x102   :  { %v676_v10 = vmul.f32 0.2, %v4151_v8  ;;  %v467_v11 = vpop.f32.mrb[17].mxu0  ;;  %v4443_v4 = vld [vmem:[%s5845_s2 + $0x394] ss:$8 sps:$4 sm:$0xff]  }
 0x103   :  { %v674_v12 = vmul.f32 0.2, %v467_v11  ;;  %v4152_v13 = vpop.f32.mrb[18].mxu0 }
 0x104   :  { %v677_v14 = vmul.f32 0.2, %v4152_v13  ;;  %1073 = vmatpush1.bf16.msra.mxu0 %v4396_v6  ;;  %v470_v15 = vpop.f32.mrb[19].mxu0  ;;  %v740_v21 = vmax.f32 %v4151_v8, %v676_v10  ;;  %v4438_v10 = vld [vmem:[%s5845_s2 + $0x130] ss:$8 sps:$4 sm:$0xff]  }
 0x105   :  { %v675_v17 = vmul.f32 0.2, %v470_v15  ;;  %1074 = vmatprep.subr.bf16.mxu0 %v4404_v9  ;;  %v738_v23 = vmax.f32 %v467_v11, %v674_v12 }
 0x106   :  { %v741_v22 = vmax.f32 %v4152_v13, %v677_v14  ;;  %v4441_v13 = vld [vmem:[%s5845_s2 + $0x390] ss:$8 sps:$4 sm:$0xff]  }
 0x107   :  { %v739_v24 = vmax.f32 %v470_v15, %v675_v17  ;;  %v4449_v17 = vld [vmem:[%s5845_s2 + $0x3a4] ss:$8 sps:$4 sm:$0xff]  }
 0x108   :  { %v5072_v25 = vpack.c.bf16 %v741_v22, %v740_v21  ;;  %1075 = vmatpush1.bf16.msra.mxu0 %v4402_v16 }
 0x109   :  { %v5077_v27 = vpack.c.bf16 %v739_v24, %v738_v23  ;;  %v4155_v28 = vpop.f32.mrb[20].mxu0  ;;  %1076 = vmatprep.subr.bf16.mxu0 %v4410_v20  ;;  %v4444_v24 = vld [vmem:[%s5845_s2 + $0x140] ss:$8 sps:$4 sm:$0xff]  }
 0x10a   :  { %v680_v30 = vmul.f32 0.2, %v4155_v28  ;;  %v483_v31 = vpop.f32.mrb[21].mxu0 }
 0x10b   :  { %v678_v32 = vmul.f32 0.2, %v483_v31  ;;  %v4156_v33 = vpop.f32.mrb[22].mxu0 }
 0x10c   :  { %v681_v34 = vmul.f32 0.2, %v4156_v33  ;;  %1077 = vmatpush1.bf16.msra.mxu0 %v4408_v26  ;;  %v486_v35 = vpop.f32.mrb[23].mxu0  ;;  %v744_v39 = vmax.f32 %v4155_v28, %v680_v30  ;;  %v4447_v26 = vld [vmem:[%s5845_s2 + $0x3a0] ss:$8 sps:$4 sm:$0xff]  }
 0x10d   :  { %v679_v37 = vmul.f32 0.2, %v486_v35  ;;  %1078 = vmatprep.subr.bf16.mxu0 %v4416_v29  ;;  %v742_v41 = vmax.f32 %v483_v31, %v678_v32  ;;  %v4452_v29 = vld [vmem:[%s5845_s2 + $0x154] ss:$8 sps:$4 sm:$0xff]  }
 0x10e   :  { %v745_v40 = vmax.f32 %v4156_v33, %v681_v34  ;;  %v4455_v30 = vld [vmem:[%s5845_s2 + $0x3b4] ss:$8 sps:$4 sm:$0xff]  }
 0x10f   :  { %v743_v42 = vmax.f32 %v486_v35, %v679_v37  ;;  %v4450_v35 = vld [vmem:[%s5845_s2 + $0x150] ss:$8 sps:$4 sm:$0xff]  }
 0x110   :  { %v5088_v43 = vpack.c.bf16 %v745_v40, %v744_v39  ;;  %1079 = vmatpush1.bf16.msra.mxu0 %v4414_v36 }
 0x111   :  { %v5093_v45 = vpack.c.bf16 %v743_v42, %v742_v41  ;;  %v4159_v46 = vpop.f32.mrb[24].mxu0  ;;  %1214 = vmatprep.subr.bf16.mxu0 %v4422_v38  ;;  %v4453_v38 = vld [vmem:[%s5845_s2 + $0x3b0] ss:$8 sps:$4 sm:$0xff]   ;;  %v4458_v42 = vld [vmem:[%s5845_s2 + $0x164] ss:$8 sps:$4 sm:$0xff]  }
 0x112   :  { %v684_v48 = vmul.f32 0.2, %v4159_v46  ;;  %v499_v50 = vpop.f32.mrb[25].mxu0 }
 0x113   :  { %v682_v52 = vmul.f32 0.2, %v499_v50  ;;  %1097 = vmatmul.mubr.bf16.vlgmr.msra.gmra.mrb[64].mxu0 %v5024_v19  ;;  %v4160_v54 = vpop.f32.mrb[26].mxu0 }
 0x114   :  { %v685_v55 = vmul.f32 0.2, %v4160_v54  ;;  %1215 = vmatpush1.bf16.msra.mxu0 %v4420_v44  ;;  %v502_v56 = vpop.f32.mrb[27].mxu0  ;;  %1106 = vmatprep.mubr.bf16.mxu0 %v4744_v49  ;;  %v748_v60 = vmax.f32 %v4159_v46, %v684_v48  ;;  %v4461_v44 = vld [vmem:[%s5845_s2 + $0x3c4] ss:$8 sps:$4 sm:$0xff]  }
 0x115   :  { %v683_v58 = vmul.f32 0.2, %v502_v56  ;;  %1216 = vmatprep.subr.bf16.mxu0 %v4428_v47  ;;  %v746_v62 = vmax.f32 %v499_v50, %v682_v52  ;;  %v4456_v52 = vld [vmem:[%s5845_s2 + $0x160] ss:$8 sps:$4 sm:$0xff]  }
 0x116   :  { %v749_v61 = vmax.f32 %v4160_v54, %v685_v55  ;;  %v4459_v54 = vld [vmem:[%s5845_s2 + $0x3c0] ss:$8 sps:$4 sm:$0xff]  }
 0x117   :  { %v747_v19 = vmax.f32 %v502_v56, %v683_v58  ;;  %v4464_v56 = vld [vmem:[%s5845_s2 + $0x174] ss:$8 sps:$4 sm:$0xff]  }
 0x118   :  { %v799_v63 = vpack.c.bf16 %v749_v61, %v748_v60  ;;  %1217 = vmatpush1.bf16.msra.mxu0 %v4426_v57  ;;  %v4467_v57 = vld [vmem:[%s5845_s2 + $0x3d4] ss:$8 sps:$4 sm:$0xff]  }
 0x119   :  { %v798_v2 = vpack.c.bf16 %v747_v19, %v746_v62  ;;  %1218 = vmatprep.subr.bf16.mxu0 %v4434_v59  ;;  %v4163_v6 = vpop.f32.mrb[28].mxu0  ;;  %v4462_v62 = vld [vmem:[%s5845_s2 + $0x170] ss:$8 sps:$4 sm:$0xff]  }
 0x11a   :  { %v688_v8 = vmul.f32 0.2, %v4163_v6  ;;  %v515_v9 = vpop.f32.mrb[29].mxu0 }
 0x11b   :  { %1107 = vmatmul.mubr.bf16.gmra.mrb[68].mxu0 %v5022_v18  ;;  %1879 = vmatmul.mubr.bf16.vlgmr.msra.gmra.mrb[0].mxu1 %v798_v2  ;;  %v686_v11 = vmul.f32 0.2, %v515_v9  ;;  %v4164_v12 = vpop.f32.mrb[30].mxu0  ;;  %v4446_v18 = vld [vmem:[%s5845_s2 + $0x144] ss:$8 sps:$4 sm:$0xff]  }
 0x11c   :  { %1219 = vmatpush1.bf16.msra.mxu0 %v4432_v0  ;;  %2005 = vmatpush1.bf16.msra.mxu1 %v4435_v1  ;;  %v752_v14 = vmax.f32 %v4163_v6, %v688_v8  ;;  %v689_v15 = vmul.f32 0.2, %v4164_v12  ;;  %v518_v16 = vpop.f32.mrb[31].mxu0  ;;  %v4465_v0 = vld [vmem:[%s5845_s2 + $0x3d0] ss:$8 sps:$4 sm:$0xff]  }
 0x11d   :  { %1220 = vmatprep.subr.bf16.mxu0 %v4440_v3  ;;  %2006 = vmatprep.subr.bf16.mxu1 %v4443_v4  ;;  %v750_v20 = vmax.f32 %v515_v9, %v686_v11  ;;  %v687_v21 = vmul.f32 0.2, %v518_v16  ;;  %v4470_v4 = vld [vmem:[%s5845_s2 + $0x184] ss:$8 sps:$4 sm:$0xff]  }
 0x11e   :  { %1888 = vmatprep.mubr.bf16.mxu1 %v4744_v49  ;;  %v753_v22 = vmax.f32 %v4164_v12, %v689_v15  ;;  %1246 = vmatprep.mubr.bf16.mxu0 %v4744_v49  ;;  %v4473_v6 = vld [vmem:[%s5845_s2 + $0x3e4] ss:$8 sps:$4 sm:$0xff]   ;;  %v4468_v12 = vld [vmem:[%s5845_s2 + $0x180] ss:$8 sps:$4 sm:$0xff]   ;;  %v4476_v15 = vld [vmem:[%s5845_s2 + $0x194] ss:$8 sps:$4 sm:$0xff]  }
 0x11f   :  { %v751_v23 = vmax.f32 %v518_v16, %v687_v21  ;;  %v4479_v16 = vld [vmem:[%s5845_s2 + $0x3f4] ss:$8 sps:$4 sm:$0xff]  }
 0x120   :  { %1221 = vmatpush1.bf16.msra.mxu0 %v4438_v10  ;;  %2007 = vmatpush1.bf16.msra.mxu1 %v4441_v13  ;;  %v5139_v28 = vpack.c.bf16 %v753_v22, %v752_v14  ;;  %v4471_v13 = vld [vmem:[%s5845_s2 + $0x3e0] ss:$8 sps:$4 sm:$0xff]   ;;  %v4474_v22 = vld [vmem:[%s5845_s2 + $0x190] ss:$8 sps:$4 sm:$0xff]  }
 0x121   :  { %1222 = vmatprep.subr.bf16.mxu0 %v4446_v18  ;;  %2008 = vmatprep.subr.bf16.mxu1 %v4449_v17  ;;  %v5147_v31 = vpack.c.bf16 %v751_v23, %v750_v20  ;;  %v4167_v32 = vpop.f32.mrb[32].mxu0 }
 0x122   :  { %v692_v33 = vmul.f32 0.2, %v4167_v32  ;;  %v531_v34 = vpop.f32.mrb[33].mxu0 }
 0x123   :  { %1889 = vmatmul.mubr.bf16.gmra.mrb[4].mxu1 %v799_v63  ;;  %v690_v36 = vmul.f32 0.2, %v531_v34  ;;  %v4168_v37 = vpop.f32.mrb[34].mxu0 }
 0x124   :  { %1223 = vmatpush1.bf16.msra.mxu0 %v4444_v24  ;;  %2009 = vmatpush1.bf16.msra.mxu1 %v4447_v26  ;;  %v756_v39 = vmax.f32 %v4167_v32, %v692_v33  ;;  %v693_v40 = vmul.f32 0.2, %v4168_v37  ;;  %v534_v41 = vpop.f32.mrb[35].mxu0  ;;  %v4477_v26 = vld [vmem:[%s5845_s2 + $0x3f0] ss:$8 sps:$4 sm:$0xff]  }
 0x125   :  { %1224 = vmatprep.subr.bf16.mxu0 %v4452_v29  ;;  %2010 = vmatprep.subr.bf16.mxu1 %v4455_v30  ;;  %v754_v46 = vmax.f32 %v531_v34, %v690_v36  ;;  %v691_v47 = vmul.f32 0.2, %v534_v41  ;;  %v4485_v33 = vld [vmem:[%s5845_s2 + $0x404] ss:$8 sps:$4 sm:$0xff]  }
 0x126   :  { %2036 = vmatprep.mubr.bf16.mxu1 %v4744_v49  ;;  %v757_v48 = vmax.f32 %v4168_v37, %v693_v40 }
 0x127   :  { %v755_v50 = vmax.f32 %v534_v41, %v691_v47  ;;  %v4488_v41 = vld [vmem:[%s5845_s2 + $0x1b4] ss:$8 sps:$4 sm:$0xff]  }
 0x128   :  { %1225 = vmatpush1.bf16.msra.mxu0 %v4450_v35  ;;  %2011 = vmatpush1.bf16.msra.mxu1 %v4453_v38  ;;  %v5168_v55 = vpack.c.bf16 %v757_v48, %v756_v39  ;;  %v4480_v38 = vld [vmem:[%s5845_s2 + $0x1a0] ss:$8 sps:$4 sm:$0xff]  }
 0x129   :  { %1226 = vmatprep.subr.bf16.mxu0 %v4458_v42  ;;  %2012 = vmatprep.subr.bf16.mxu1 %v4461_v44  ;;  %v5176_v58 = vpack.c.bf16 %v755_v50, %v754_v46  ;;  %v4171_v59 = vpop.f32.mrb[36].mxu0  ;;  %v4483_v39 = vld [vmem:[%s5845_s2 + $0x400] ss:$8 sps:$4 sm:$0xff]   ;;  %v4491_v42 = vld [vmem:[%s5845_s2 + $0x414] ss:$8 sps:$4 sm:$0xff]  }
 0x12a   :  { %v696_v60 = vmul.f32 0.2, %v4171_v59  ;;  %v547_v61 = vpop.f32.mrb[37].mxu0  ;;  %v4486_v50 = vld [vmem:[%s5845_s2 + $0x1b0] ss:$8 sps:$4 sm:$0xff]  }
 0x12b   :  { %v694_v19 = vmul.f32 0.2, %v547_v61  ;;  %v4172_v63 = vpop.f32.mrb[38].mxu0 }
 0x12c   :  { %1227 = vmatpush1.bf16.msra.mxu0 %v4456_v52  ;;  %2013 = vmatpush1.bf16.msra.mxu1 %v4459_v54  ;;  %v760_v1 = vmax.f32 %v4171_v59, %v696_v60  ;;  %v697_v2 = vmul.f32 0.2, %v4172_v63  ;;  %v550_v3 = vpop.f32.mrb[39].mxu0 }
 0x12d   :  { %1228 = vmatprep.subr.bf16.mxu0 %v4464_v56  ;;  %2014 = vmatprep.subr.bf16.mxu1 %v4467_v57  ;;  %v758_v8 = vmax.f32 %v547_v61, %v694_v19  ;;  %v695_v9 = vmul.f32 0.2, %v550_v3  ;;  %v4489_v56 = vld [vmem:[%s5845_s2 + $0x410] ss:$8 sps:$4 sm:$0xff]  }
 0x12e   :  { %v761_v10 = vmax.f32 %v4172_v63, %v697_v2 }
 0x12f   :  { %v759_v11 = vmax.f32 %v550_v3, %v695_v9  ;;  %v4500_v3 = vld [vmem:[%s5845_s2 + $0x1d4] ss:$8 sps:$4 sm:$0xff]   ;;  %v4501_v9 = vld [vmem:[%s5845_s2 + $0x430] ss:$8 sps:$4 sm:$0xff]  }
 0x130   :  { %1229 = vmatpush1.bf16.msra.mxu0 %v4462_v62  ;;  %2015 = vmatpush1.bf16.msra.mxu1 %v4465_v0  ;;  %v5196_v14 = vpack.c.bf16 %v761_v10, %v760_v1  ;;  %v4492_v0 = vld [vmem:[%s5845_s2 + $0x1c0] ss:$8 sps:$4 sm:$0xff]   ;;  %v4506_v10 = vld [vmem:[%s5845_s2 + $0x1e4] ss:$8 sps:$4 sm:$0xff]  }
 0x131   :  { %1372 = vmatprep.subr.bf16.mxu0 %v4470_v4  ;;  %2016 = vmatprep.subr.bf16.mxu1 %v4473_v6  ;;  %v5204_v18 = vpack.c.bf16 %v759_v11, %v758_v8  ;;  %v4175_v17 = vpop.f32.mrb[40].mxu0  ;;  %v4495_v1 = vld [vmem:[%s5845_s2 + $0x420] ss:$8 sps:$4 sm:$0xff]   ;;  %v4503_v4 = vld [vmem:[%s5845_s2 + $0x434] ss:$8 sps:$4 sm:$0xff]  }
 0x132   :  { %v700_v20 = vmul.f32 0.2, %v4175_v17  ;;  %v563_v21 = vpop.f32.mrb[41].mxu0  ;;  %v4498_v8 = vld [vmem:[%s5845_s2 + $0x1d0] ss:$8 sps:$4 sm:$0xff]  }
 0x133   :  { %1247 = vmatmul.mubr.bf16.vlgmr.msra.gmra.mrb[64].mxu0 %v5044_v53  ;;  %v698_v23 = vmul.f32 0.2, %v563_v21  ;;  %v4176_v24 = vpop.f32.mrb[42].mxu0  ;;  %v4482_v53 = vld [vmem:[%s5845_s2 + $0x1a4] ss:$8 sps:$4 sm:$0xff]  }
 0x134   :  { %1373 = vmatpush1.bf16.msra.mxu0 %v4468_v12  ;;  %2017 = vmatpush1.bf16.msra.mxu1 %v4471_v13  ;;  %v764_v29 = vmax.f32 %v4175_v17, %v700_v20  ;;  %v701_v30 = vmul.f32 0.2, %v4176_v24  ;;  %v566_v32 = vpop.f32.mrb[43].mxu0  ;;  %v4504_v11 = vld [vmem:[%s5845_s2 + $0x1e0] ss:$8 sps:$4 sm:$0xff]  }
 0x135   :  { %1374 = vmatprep.subr.bf16.mxu0 %v4476_v15  ;;  %2018 = vmatprep.subr.bf16.mxu1 %v4479_v16  ;;  %v762_v34 = vmax.f32 %v563_v21, %v698_v23  ;;  %v699_v35 = vmul.f32 0.2, %v566_v32  ;;  %v4507_v12 = vld [vmem:[%s5845_s2 + $0x440] ss:$8 sps:$4 sm:$0xff]   ;;  %v4512_v13 = vld [vmem:[%s5845_s2 + $0x1f4] ss:$8 sps:$4 sm:$0xff]  }
 0x136   :  { %1256 = vmatprep.mubr.bf16.mxu0 %v4744_v49  ;;  %v765_v36 = vmax.f32 %v4176_v24, %v701_v30  ;;  %v4515_v15 = vld [vmem:[%s5845_s2 + $0x454] ss:$8 sps:$4 sm:$0xff]   ;;  %v4510_v16 = vld [vmem:[%s5845_s2 + $0x1f0] ss:$8 sps:$4 sm:$0xff]   ;;  %v4518_v20 = vld [vmem:[%s5845_s2 + $0x204] ss:$8 sps:$4 sm:$0xff]  }
 0x137   :  { %v763_v37 = vmax.f32 %v566_v32, %v699_v35  ;;  %v4513_v17 = vld [vmem:[%s5845_s2 + $0x450] ss:$8 sps:$4 sm:$0xff]  }
 0x138   :  { %1375 = vmatpush1.bf16.msra.mxu0 %v4474_v22  ;;  %2019 = vmatpush1.bf16.msra.mxu1 %v4477_v26  ;;  %v5226_v40 = vpack.c.bf16 %v765_v36, %v764_v29  ;;  %v4521_v22 = vld [vmem:[%s5845_s2 + $0x464] ss:$8 sps:$4 sm:$0xff]  }
 0x139   :  { %1376 = vmatprep.subr.bf16.mxu0 %v4482_v53  ;;  %2162 = vmatprep.subr.bf16.mxu1 %v4485_v33  ;;  %v5234_v44 = vpack.c.bf16 %v763_v37, %v762_v34  ;;  %v4179_v46 = vpop.f32.mrb[44].mxu0  ;;  %v4516_v33 = vld [vmem:[%s5845_s2 + $0x200] ss:$8 sps:$4 sm:$0xff]   ;;  %v4524_v37 = vld [vmem:[%s5845_s2 + $0x214] ss:$8 sps:$4 sm:$0xff]  }
 0x13a   :  { %v704_v47 = vmul.f32 0.2, %v4179_v46  ;;  %v579_v48 = vpop.f32.mrb[45].mxu0  ;;  %v4519_v34 = vld [vmem:[%s5845_s2 + $0x460] ss:$8 sps:$4 sm:$0xff]  }
 0x13b   :  { %1257 = vmatmul.mubr.bf16.gmra.mrb[68].mxu0 %v5039_v51  ;;  %2037 = vmatmul.mubr.bf16.vlgmr.msra.gmra.mrb[0].mxu1 %v5147_v31  ;;  %v702_v52 = vmul.f32 0.2, %v579_v48  ;;  %v4180_v54 = vpop.f32.mrb[46].mxu0  ;;  %v4494_v51 = vld [vmem:[%s5845_s2 + $0x1c4] ss:$8 sps:$4 sm:$0xff]  }
 0x13c   :  { %1377 = vmatpush1.bf16.msra.mxu0 %v4480_v38  ;;  %2163 = vmatpush1.bf16.msra.mxu1 %v4483_v39  ;;  %v768_v57 = vmax.f32 %v4179_v46, %v704_v47  ;;  %v705_v59 = vmul.f32 0.2, %v4180_v54  ;;  %v582_v60 = vpop.f32.mrb[47].mxu0  ;;  %v4497_v31 = vld [vmem:[%s5845_s2 + $0x424] ss:$8 sps:$4 sm:$0xff]  }
 0x13d   :  { %1378 = vmatprep.subr.bf16.mxu0 %v4488_v41  ;;  %2164 = vmatprep.subr.bf16.mxu1 %v4491_v42  ;;  %v766_v61 = vmax.f32 %v579_v48, %v702_v52  ;;  %v703_v62 = vmul.f32 0.2, %v582_v60  ;;  %v4527_v38 = vld [vmem:[%s5845_s2 + $0x474] ss:$8 sps:$4 sm:$0xff]   ;;  %v4522_v46 = vld [vmem:[%s5845_s2 + $0x210] ss:$8 sps:$4 sm:$0xff]  }
 0x13e   :  { %2046 = vmatprep.mubr.bf16.mxu1 %v4744_v49  ;;  %1404 = vmatprep.mubr.bf16.mxu0 %v4744_v49  ;;  %v769_v19 = vmax.f32 %v4180_v54, %v705_v59  ;;  %v4525_v47 = vld [vmem:[%s5845_s2 + $0x470] ss:$8 sps:$4 sm:$0xff]   ;;  %v4528_v52 = vld [vmem:[%s5845_s2 + $0x220] ss:$8 sps:$4 sm:$0xff]  }
 0x13f   :  { %v767_v63 = vmax.f32 %v582_v60, %v703_v62  ;;  %v4531_v54 = vld [vmem:[%s5845_s2 + $0x480] ss:$8 sps:$4 sm:$0xff]   ;;  %v4534_v59 = vld [vmem:[%s5845_s2 + $0x230] ss:$8 sps:$4 sm:$0xff]   ;;  %v4551_v62 = vld [vmem:[%s5845_s2 + $0x4b4] ss:$8 sps:$4 sm:$0xff]  }
 0x140   :  { %1379 = vmatpush1.bf16.msra.mxu0 %v4486_v50  ;;  %2165 = vmatpush1.bf16.msra.mxu1 %v4489_v56  ;;  %v5258_v2 = vpack.c.bf16 %v769_v19, %v768_v57  ;;  %v4533_v50 = vld [vmem:[%s5845_s2 + $0x484] ss:$8 sps:$4 sm:$0xff]   ;;  %v4536_v56 = vld [vmem:[%s5845_s2 + $0x234] ss:$8 sps:$4 sm:$0xff]   ;;  %v4537_v60 = vld [vmem:[%s5845_s2 + $0x490] ss:$8 sps:$4 sm:$0xff]  }
 0x141   :  { %1380 = vmatprep.subr.bf16.mxu0 %v4494_v51  ;;  %2166 = vmatprep.subr.bf16.mxu1 %v4497_v31  ;;  %v5266_v6 = vpack.c.bf16 %v767_v63, %v766_v61  ;;  %v4183_v21 = vpop.f32.mrb[48].mxu0  ;;  %v4539_v57 = vld [vmem:[%s5845_s2 + $0x494] ss:$8 sps:$4 sm:$0xff]   ;;  %v4542_v51 = vld [vmem:[%s5845_s2 + $0x244] ss:$8 sps:$4 sm:$0xff]  }
 0x142   :  { %v708_v23 = vmul.f32 0.2, %v4183_v21  ;;  %v595_v24 = vpop.f32.mrb[49].mxu0  ;;  %v4543_v31 = vld [vmem:[%s5845_s2 + $0x4a0] ss:$8 sps:$4 sm:$0xff]  }
 0x143   :  { %2047 = vmatmul.mubr.bf16.gmra.mrb[4].mxu1 %v5139_v28  ;;  %v4509_v28 = vld [vmem:[%s5845_s2 + $0x444] ss:$8 sps:$4 sm:$0xff]   ;;  %v706_v26 = vmul.f32 0.2, %v595_v24  ;;  %v4184_v29 = vpop.f32.mrb[50].mxu0 }
 0x144   :  { %1381 = vmatpush1.bf16.msra.mxu0 %v4492_v0  ;;  %2167 = vmatpush1.bf16.msra.mxu1 %v4495_v1  ;;  %v772_v30 = vmax.f32 %v4183_v21, %v708_v23  ;;  %v709_v32 = vmul.f32 0.2, %v4184_v29  ;;  %v598_v53 = vpop.f32.mrb[51].mxu0  ;;  %v4548_v61 = vld [vmem:[%s5845_s2 + $0x254] ss:$8 sps:$4 sm:$0xff]  }
 0x145   :  { %1382 = vmatprep.subr.bf16.mxu0 %v4500_v3  ;;  %2168 = vmatprep.subr.bf16.mxu1 %v4503_v4  ;;  %v770_v35 = vmax.f32 %v595_v24, %v706_v26  ;;  %v707_v36 = vmul.f32 0.2, %v598_v53  ;;  %v4546_v19 = vld [vmem:[%s5845_s2 + $0x250] ss:$8 sps:$4 sm:$0xff]   ;;  %v4554_v0 = vld [vmem:[%s5845_s2 + $0x264] ss:$8 sps:$4 sm:$0xff]  }
 0x146   :  { %2194 = vmatprep.mubr.bf16.mxu1 %v4744_v49  ;;  %v773_v39 = vmax.f32 %v4184_v29, %v709_v32  ;;  %v4549_v63 = vld [vmem:[%s5845_s2 + $0x4b0] ss:$8 sps:$4 sm:$0xff]   ;;  %v4552_v1 = vld [vmem:[%s5845_s2 + $0x260] ss:$8 sps:$4 sm:$0xff]   ;;  %v4560_v4 = vld [vmem:[%s5845_s2 + $0x274] ss:$8 sps:$4 sm:$0xff]  }
 0x147   :  { %v771_v41 = vmax.f32 %v598_v53, %v707_v36  ;;  %v4555_v3 = vld [vmem:[%s5845_s2 + $0x4c0] ss:$8 sps:$4 sm:$0xff]   ;;  %v4575_v32 = vld [vmem:[%s5845_s2 + $0x4f4] ss:$8 sps:$4 sm:$0xff]   ;;  %v4573_v36 = vld [vmem:[%s5845_s2 + $0x4f0] ss:$8 sps:$4 sm:$0xff]  }
 0x148   :  { %1383 = vmatpush1.bf16.msra.mxu0 %v4498_v8  ;;  %2169 = vmatpush1.bf16.msra.mxu1 %v4501_v9  ;;  %v5319_v42 = vpack.c.bf16 %v773_v39, %v772_v30  ;;  %v4563_v8 = vld [vmem:[%s5845_s2 + $0x4d4] ss:$8 sps:$4 sm:$0xff]   ;;  %v4558_v9 = vld [vmem:[%s5845_s2 + $0x270] ss:$8 sps:$4 sm:$0xff]   ;;  %v4564_v23 = vld [vmem:[%s5845_s2 + $0x280] ss:$8 sps:$4 sm:$0xff]  }
 0x149   :  { %1384 = vmatprep.subr.bf16.mxu0 %v4506_v10  ;;  %2170 = vmatprep.subr.bf16.mxu1 %v4509_v28  ;;  %v5327_v48 = vpack.c.bf16 %v771_v41, %v770_v35  ;;  %v4561_v10 = vld [vmem:[%s5845_s2 + $0x4d0] ss:$8 sps:$4 sm:$0xff]   ;;  %v4566_v28 = vld [vmem:[%s5845_s2 + $0x284] ss:$8 sps:$4 sm:$0xff]   ;;  %v4567_v24 = vld [vmem:[%s5845_s2 + $0x4e0] ss:$8 sps:$4 sm:$0xff]  }
 0x14a   :  { %v4572_v30 = vld [vmem:[%s5845_s2 + $0x294] ss:$8 sps:$4 sm:$0xff]   ;;  %v4570_v35 = vld [vmem:[%s5845_s2 + $0x290] ss:$8 sps:$4 sm:$0xff]   ;;  %v4576_v39 = vld [vmem:[%s5845_s2 + $0x2a0] ss:$8 sps:$4 sm:$0xff]  }
 0x14b   :  { %v4579_v41 = vld [vmem:[%s5845_s2 + $0x500] ss:$8 sps:$4 sm:$0xff]  }
 0x14c   :  { %1385 = vmatpush1.bf16.msra.mxu0 %v4504_v11  ;;  %2171 = vmatpush1.bf16.msra.mxu1 %v4507_v12  ;;  %v4187_v11 = vpop.f32.mrb[52].mxu0  ;;  %v4569_v12 = vld [vmem:[%s5845_s2 + $0x4e4] ss:$8 sps:$4 sm:$0xff]  }
 0x14d   :  { %1386 = vmatprep.subr.bf16.mxu0 %v4512_v13  ;;  %2172 = vmatprep.subr.bf16.mxu1 %v4515_v15  ;;  %v712_v13 = vmul.f32 0.2, %v4187_v11  ;;  %v611_v15 = vpop.f32.mrb[53].mxu0 }
 0x150   :  { %1387 = vmatpush1.bf16.msra.mxu0 %v4510_v16  ;;  %2173 = vmatpush1.bf16.msra.mxu1 %v4513_v17  ;;  %v710_v16 = vmul.f32 0.2, %v611_v15  ;;  %v4188_v17 = vpop.f32.mrb[54].mxu0 }
 0x151   :  { %1530 = vmatprep.subr.bf16.mxu0 %v4518_v20  ;;  %2174 = vmatprep.subr.bf16.mxu1 %v4521_v22  ;;  %v776_v20 = vmax.f32 %v4187_v11, %v712_v13  ;;  %v713_v21 = vmul.f32 0.2, %v4188_v17  ;;  %v614_v22 = vpop.f32.mrb[55].mxu0  ;;  %v4617_v13 = vld [vmem:[%s5845_s2 + $0x574] ss:$8 sps:$4 sm:$0xff]  }
 0x152   :  { %v774_v26 = vmax.f32 %v611_v15, %v710_v16  ;;  %v711_v29 = vmul.f32 0.2, %v614_v22 }
 0x153   :  { %1405 = vmatmul.mubr.bf16.vlgmr.msra.gmra.mrb[64].mxu0 %v5061_v7  ;;  %v4530_v7 = vld [vmem:[%s5845_s2 + $0x224] ss:$8 sps:$4 sm:$0xff]   ;;  %v777_v53 = vmax.f32 %v4188_v17, %v713_v21 }
 0x154   :  { %1531 = vmatpush1.bf16.msra.mxu0 %v4516_v33  ;;  %2175 = vmatpush1.bf16.msra.mxu1 %v4519_v34  ;;  %v775_v33 = vmax.f32 %v614_v22, %v711_v29  ;;  %v4620_v22 = vld [vmem:[%s5845_s2 + $0x584] ss:$8 sps:$4 sm:$0xff]   ;;  %v4624_v29 = vld [vmem:[%s5845_s2 + $0x5a0] ss:$8 sps:$4 sm:$0xff]  }
 0x155   :  { %1532 = vmatprep.subr.bf16.mxu0 %v4524_v37  ;;  %2176 = vmatprep.subr.bf16.mxu1 %v4527_v38  ;;  %v5427_v34 = vpack.c.bf16 %v777_v53, %v776_v20  ;;  %v4581_v38 = vld [vmem:[%s5845_s2 + $0x504] ss:$8 sps:$4 sm:$0xff]   ;;  %v4615_v20 = vld [vmem:[%s5845_s2 + $0x570] ss:$8 sps:$4 sm:$0xff]  }
 0x156   :  { %1414 = vmatprep.mubr.bf16.mxu0 %v4744_v49  ;;  %v5435_v37 = vpack.c.bf16 %v775_v33, %v774_v26  ;;  %v4626_v26 = vld [vmem:[%s5845_s2 + $0x5a4] ss:$8 sps:$4 sm:$0xff]  }
 0x158   :  { %1533 = vmatpush1.bf16.msra.mxu0 %v4522_v46  ;;  %2177 = vmatpush1.bf16.msra.mxu1 %v4525_v47  ;;  %v4584_v46 = vld [vmem:[%s5845_s2 + $0x2b4] ss:$8 sps:$4 sm:$0xff]  }
 0x159   :  { %1534 = vmatprep.subr.bf16.mxu0 %v4530_v7  ;;  %2320 = vmatprep.subr.bf16.mxu1 %v4533_v50  ;;  %v4587_v47 = vld [vmem:[%s5845_s2 + $0x514] ss:$8 sps:$4 sm:$0xff]   ;;  %v4582_v7 = vld [vmem:[%s5845_s2 + $0x2b0] ss:$8 sps:$4 sm:$0xff]  }
 0x15a   :  { %v4585_v50 = vld [vmem:[%s5845_s2 + $0x510] ss:$8 sps:$4 sm:$0xff]  }
 0x15b   :  { %1415 = vmatmul.mubr.bf16.gmra.mrb[68].mxu0 %v5056_v5  ;;  %2195 = vmatmul.mubr.bf16.vlgmr.msra.gmra.mrb[0].mxu1 %v5176_v58  ;;  %v4545_v5 = vld [vmem:[%s5845_s2 + $0x4a4] ss:$8 sps:$4 sm:$0xff]   ;;  %v4540_v58 = vld [vmem:[%s5845_s2 + $0x240] ss:$8 sps:$4 sm:$0xff]  }
 0x15c   :  { %1535 = vmatpush1.bf16.msra.mxu0 %v4528_v52  ;;  %2321 = vmatpush1.bf16.msra.mxu1 %v4531_v54  ;;  %v4590_v52 = vld [vmem:[%s5845_s2 + $0x2c4] ss:$8 sps:$4 sm:$0xff]   ;;  %v4591_v54 = vld [vmem:[%s5845_s2 + $0x520] ss:$8 sps:$4 sm:$0xff]  }
 0x15d   :  { %1536 = vmatprep.subr.bf16.mxu0 %v4536_v56  ;;  %2322 = vmatprep.subr.bf16.mxu1 %v4539_v57  ;;  %v4596_v56 = vld [vmem:[%s5845_s2 + $0x2d4] ss:$8 sps:$4 sm:$0xff]  }
 0x15e   :  { %2204 = vmatprep.mubr.bf16.mxu1 %v4744_v49  ;;  %1562 = vmatprep.mubr.bf16.mxu0 %v4744_v49  ;;  %v4599_v57 = vld [vmem:[%s5845_s2 + $0x534] ss:$8 sps:$4 sm:$0xff]  }
 0x160   :  { %1537 = vmatpush1.bf16.msra.mxu0 %v4534_v59  ;;  %2323 = vmatpush1.bf16.msra.mxu1 %v4537_v60  ;;  %v4594_v59 = vld [vmem:[%s5845_s2 + $0x2d0] ss:$8 sps:$4 sm:$0xff]  }
 0x161   :  { %1538 = vmatprep.subr.bf16.mxu0 %v4542_v51  ;;  %2324 = vmatprep.subr.bf16.mxu1 %v4545_v5  ;;  %v4597_v60 = vld [vmem:[%s5845_s2 + $0x530] ss:$8 sps:$4 sm:$0xff]   ;;  %v4602_v51 = vld [vmem:[%s5845_s2 + $0x2e4] ss:$8 sps:$4 sm:$0xff]   ;;  %v4600_v5 = vld [vmem:[%s5845_s2 + $0x2e0] ss:$8 sps:$4 sm:$0xff]  }
 0x163   :  { %2205 = vmatmul.mubr.bf16.gmra.mrb[4].mxu1 %v5168_v55  ;;  %v4557_v55 = vld [vmem:[%s5845_s2 + $0x4c4] ss:$8 sps:$4 sm:$0xff]  }
 0x164   :  { %1539 = vmatpush1.bf16.msra.mxu0 %v4540_v58  ;;  %2325 = vmatpush1.bf16.msra.mxu1 %v4543_v31  ;;  %v4603_v58 = vld [vmem:[%s5845_s2 + $0x540] ss:$8 sps:$4 sm:$0xff]   ;;  %v4608_v31 = vld [vmem:[%s5845_s2 + $0x2f4] ss:$8 sps:$4 sm:$0xff]  }
 0x165   :  { %1540 = vmatprep.subr.bf16.mxu0 %v4548_v61  ;;  %2326 = vmatprep.subr.bf16.mxu1 %v4551_v62  ;;  %v4611_v61 = vld [vmem:[%s5845_s2 + $0x554] ss:$8 sps:$4 sm:$0xff]   ;;  %v4606_v62 = vld [vmem:[%s5845_s2 + $0x2f0] ss:$8 sps:$4 sm:$0xff]  }
 0x166   :  { %2352 = vmatprep.mubr.bf16.mxu1 %v4744_v49 }
 0x168   :  { %1541 = vmatpush1.bf16.msra.mxu0 %v4546_v19  ;;  %2327 = vmatpush1.bf16.msra.mxu1 %v4549_v63  ;;  %v4609_v19 = vld [vmem:[%s5845_s2 + $0x550] ss:$8 sps:$4 sm:$0xff]   ;;  %v4191_v63 = vpop.f32.mrb[56].mxu0 }
 0x169   :  { %1542 = vmatprep.subr.bf16.mxu0 %v4554_v0  ;;  %2328 = vmatprep.subr.bf16.mxu1 %v4557_v55  ;;  %v4614_v0 = vld [vmem:[%s5845_s2 + $0x564] ss:$8 sps:$4 sm:$0xff]   ;;  %v716_v55 = vmul.f32 0.2, %v4191_v63 }
 0x16c   :  { %1543 = vmatpush1.bf16.msra.mxu0 %v4552_v1  ;;  %2329 = vmatpush1.bf16.msra.mxu1 %v4555_v3  ;;  %v627_v1 = vpop.f32.mrb[57].mxu0 }
 0x16d   :  { %1544 = vmatprep.subr.bf16.mxu0 %v4560_v4  ;;  %2330 = vmatprep.subr.bf16.mxu1 %v4563_v8  ;;  %v714_v3 = vmul.f32 0.2, %v627_v1  ;;  %v4192_v4 = vpop.f32.mrb[58].mxu0  ;;  %v780_v8 = vmax.f32 %v4191_v63, %v716_v55  ;;  %v4657_v63 = vld [vmem:[%s5845_s2 + $0x650] ss:$8 sps:$4 sm:$0xff]  }
 0x16e   :  { %v4660_v55 = vld [vmem:[%s5845_s2 + $0x660] ss:$8 sps:$4 sm:$0xff]  }
 0x16f   :  { %v778_v11 = vmax.f32 %v627_v1, %v714_v3  ;;  %v4665_v1 = vld [vmem:[%s5845_s2 + $0x674] ss:$8 sps:$4 sm:$0xff]   ;;  %v4663_v3 = vld [vmem:[%s5845_s2 + $0x670] ss:$8 sps:$4 sm:$0xff]  }
 0x170   :  { %1545 = vmatpush1.bf16.msra.mxu0 %v4558_v9  ;;  %2331 = vmatpush1.bf16.msra.mxu1 %v4561_v10  ;;  %v717_v9 = vmul.f32 0.2, %v4192_v4  ;;  %v630_v10 = vpop.f32.mrb[59].mxu0 }
 0x171   :  { %1688 = vmatprep.subr.bf16.mxu0 %v4566_v28  ;;  %2332 = vmatprep.subr.bf16.mxu1 %v4569_v12  ;;  %v4612_v28 = vld [vmem:[%s5845_s2 + $0x560] ss:$8 sps:$4 sm:$0xff]   ;;  %v715_v12 = vmul.f32 0.2, %v630_v10  ;;  %v4195_v53 = vpop.f32.mrb[60].mxu0 }
 0x172   :  { %v781_v15 = vmax.f32 %v4192_v4, %v717_v9  ;;  %v720_v33 = vmul.f32 0.2, %v4195_v53  ;;  %v4668_v4 = vld [vmem:[%s5845_s2 + $0x684] ss:$8 sps:$4 sm:$0xff]   ;;  %v4671_v9 = vld [vmem:[%s5845_s2 + $0x694] ss:$8 sps:$4 sm:$0xff]  }
 0x173   :  { %1563 = vmatmul.mubr.bf16.vlgmr.msra.gmra.mrb[64].mxu0 %v5077_v27  ;;  %v4578_v27 = vld [vmem:[%s5845_s2 + $0x2a4] ss:$8 sps:$4 sm:$0xff]   ;;  %v779_v16 = vmax.f32 %v630_v10, %v715_v12  ;;  %v4669_v10 = vld [vmem:[%s5845_s2 + $0x690] ss:$8 sps:$4 sm:$0xff]  }
 0x174   :  { %1689 = vmatpush1.bf16.msra.mxu0 %v4564_v23  ;;  %2333 = vmatpush1.bf16.msra.mxu1 %v4567_v24  ;;  %v5526_v17 = vpack.c.bf16 %v781_v15, %v780_v8  ;;  %v4623_v23 = vld [vmem:[%s5845_s2 + $0x594] ss:$8 sps:$4 sm:$0xff]   ;;  %v4621_v24 = vld [vmem:[%s5845_s2 + $0x590] ss:$8 sps:$4 sm:$0xff]   ;;  %v4666_v8 = vld [vmem:[%s5845_s2 + $0x680] ss:$8 sps:$4 sm:$0xff]  }
 0x175   :  { %1690 = vmatprep.subr.bf16.mxu0 %v4572_v30  ;;  %2334 = vmatprep.subr.bf16.mxu1 %v4575_v32  ;;  %v5532_v21 = vpack.c.bf16 %v779_v16, %v778_v11  ;;  %v4632_v30 = vld [vmem:[%s5845_s2 + $0x5c4] ss:$8 sps:$4 sm:$0xff]   ;;  %v4630_v32 = vld [vmem:[%s5845_s2 + $0x5c0] ss:$8 sps:$4 sm:$0xff]   ;;  %v4675_v12 = vld [vmem:[%s5845_s2 + $0x6b0] ss:$8 sps:$4 sm:$0xff]  }
 0x176   :  { %1572 = vmatprep.mubr.bf16.mxu0 %v4744_v49  ;;  %v4672_v11 = vld [vmem:[%s5845_s2 + $0x6a0] ss:$8 sps:$4 sm:$0xff]   ;;  %v4681_v16 = vld [vmem:[%s5845_s2 + $0x6d0] ss:$8 sps:$4 sm:$0xff]  }
 0x177   :  { %v4678_v15 = vld [vmem:[%s5845_s2 + $0x6c0] ss:$8 sps:$4 sm:$0xff]  }
 0x178   :  { %1691 = vmatpush1.bf16.msra.mxu0 %v4570_v35  ;;  %2335 = vmatpush1.bf16.msra.mxu1 %v4573_v36  ;;  %v4633_v35 = vld [vmem:[%s5845_s2 + $0x5d0] ss:$8 sps:$4 sm:$0xff]   ;;  %v643_v36 = vpop.f32.mrb[61].mxu0 }
 0x179   :  { %1692 = vmatprep.subr.bf16.mxu0 %v4578_v27  ;;  %2478 = vmatprep.subr.bf16.mxu1 %v4581_v38  ;;  %v4638_v27 = vld [vmem:[%s5845_s2 + $0x5e4] ss:$8 sps:$4 sm:$0xff]   ;;  %v718_v38 = vmul.f32 0.2, %v643_v36 }
 0x17b   :  { %1573 = vmatmul.mubr.bf16.gmra.mrb[68].mxu0 %v5072_v25  ;;  %2353 = vmatmul.mubr.bf16.vlgmr.msra.gmra.mrb[0].mxu1 %v5204_v18  ;;  %v4593_v25 = vld [vmem:[%s5845_s2 + $0x524] ss:$8 sps:$4 sm:$0xff]   ;;  %v4588_v18 = vld [vmem:[%s5845_s2 + $0x2c0] ss:$8 sps:$4 sm:$0xff]  }
 0x17c   :  { %1693 = vmatpush1.bf16.msra.mxu0 %v4576_v39  ;;  %2479 = vmatpush1.bf16.msra.mxu1 %v4579_v41  ;;  %v4196_v39 = vpop.f32.mrb[62].mxu0  ;;  %v784_v41 = vmax.f32 %v4195_v53, %v720_v33  ;;  %v4702_v53 = vld [vmem:[%s5845_s2 + $0x740] ss:$8 sps:$4 sm:$0xff]   ;;  %v4705_v33 = vld [vmem:[%s5845_s2 + $0x750] ss:$8 sps:$4 sm:$0xff]  }
 0x17d   :  { %1694 = vmatprep.subr.bf16.mxu0 %v4584_v46  ;;  %2480 = vmatprep.subr.bf16.mxu1 %v4587_v47  ;;  %v721_v46 = vmul.f32 0.2, %v4196_v39  ;;  %v646_v47 = vpop.f32.mrb[63].mxu0 }
 0x17e   :  { %2362 = vmatprep.mubr.bf16.mxu1 %v4744_v49  ;;  %1720 = vmatprep.mubr.bf16.mxu0 %v4744_v49 }
 0x180   :  { %1695 = vmatpush1.bf16.msra.mxu0 %v4582_v7  ;;  %2481 = vmatpush1.bf16.msra.mxu1 %v4585_v50  ;;  %v782_v7 = vmax.f32 %v643_v36, %v718_v38  ;;  %v719_v50 = vmul.f32 0.2, %v646_v47  ;;  %v4708_v36 = vld [vmem:[%s5845_s2 + $0x760] ss:$8 sps:$4 sm:$0xff]   ;;  %v4711_v38 = vld [vmem:[%s5845_s2 + $0x770] ss:$8 sps:$4 sm:$0xff]  }
 0x181   :  { %1696 = vmatprep.subr.bf16.mxu0 %v4590_v52  ;;  %2482 = vmatprep.subr.bf16.mxu1 %v4593_v25  ;;  %v4636_v52 = vld [vmem:[%s5845_s2 + $0x5e0] ss:$8 sps:$4 sm:$0xff]   ;;  %v785_v25 = vmax.f32 %v4196_v39, %v721_v46  ;;  %v4716_v39 = vld [vmem:[%s5845_s2 + $0x784] ss:$8 sps:$4 sm:$0xff]   ;;  %v4719_v46 = vld [vmem:[%s5845_s2 + $0x794] ss:$8 sps:$4 sm:$0xff]  }
 0x183   :  { %2363 = vmatmul.mubr.bf16.gmra.mrb[4].mxu1 %v5196_v14  ;;  %v4605_v14 = vld [vmem:[%s5845_s2 + $0x544] ss:$8 sps:$4 sm:$0xff]  }
 0x184   :  { %1697 = vmatpush1.bf16.msra.mxu0 %v4588_v18  ;;  %2483 = vmatpush1.bf16.msra.mxu1 %v4591_v54  ;;  %v4641_v18 = vld [vmem:[%s5845_s2 + $0x5f4] ss:$8 sps:$4 sm:$0xff]   ;;  %v783_v54 = vmax.f32 %v646_v47, %v719_v50  ;;  %v4717_v47 = vld [vmem:[%s5845_s2 + $0x790] ss:$8 sps:$4 sm:$0xff]   ;;  %v4720_v50 = vld [vmem:[%s5845_s2 + $0x7a0] ss:$8 sps:$4 sm:$0xff]  }
 0x185   :  { %1698 = vmatprep.subr.bf16.mxu0 %v4596_v56  ;;  %2484 = vmatprep.subr.bf16.mxu1 %v4599_v57  ;;  %v5584_v56 = vpack.c.bf16 %v785_v25, %v784_v41  ;;  %v4714_v41 = vld [vmem:[%s5845_s2 + $0x780] ss:$8 sps:$4 sm:$0xff]   ;;  %v4728_v25 = vld [vmem:[%s5845_s2 + $0x7c4] ss:$8 sps:$4 sm:$0xff]  }
 0x186   :  { %2510 = vmatprep.mubr.bf16.mxu1 %v4744_v49  ;;  %v5586_v57 = vpack.c.bf16 %v783_v54, %v782_v7  ;;  %v4722_v7 = vld [vmem:[%s5845_s2 + $0x7a4] ss:$8 sps:$4 sm:$0xff]   ;;  %v4729_v54 = vld [vmem:[%s5845_s2 + $0x7d0] ss:$8 sps:$4 sm:$0xff]  }
 0x188   :  { %1699 = vmatpush1.bf16.msra.mxu0 %v4594_v59  ;;  %2485 = vmatpush1.bf16.msra.mxu1 %v4597_v60  ;;  %v4639_v59 = vld [vmem:[%s5845_s2 + $0x5f0] ss:$8 sps:$4 sm:$0xff]   ;;  %v4644_v60 = vld [vmem:[%s5845_s2 + $0x604] ss:$8 sps:$4 sm:$0xff]  }
 0x189   :  { %1700 = vmatprep.subr.bf16.mxu0 %v4602_v51  ;;  %2486 = vmatprep.subr.bf16.mxu1 %v4605_v14  ;;  %v4642_v51 = vld [vmem:[%s5845_s2 + $0x600] ss:$8 sps:$4 sm:$0xff]   ;;  %v4647_v14 = vld [vmem:[%s5845_s2 + $0x614] ss:$8 sps:$4 sm:$0xff]  }
 0x18c   :  { %1701 = vmatpush1.bf16.msra.mxu0 %v4600_v5  ;;  %2487 = vmatpush1.bf16.msra.mxu1 %v4603_v58  ;;  %v4645_v5 = vld [vmem:[%s5845_s2 + $0x610] ss:$8 sps:$4 sm:$0xff]   ;;  %v4650_v58 = vld [vmem:[%s5845_s2 + $0x624] ss:$8 sps:$4 sm:$0xff]  }
 0x18d   :  { %1702 = vmatprep.subr.bf16.mxu0 %v4608_v31  ;;  %2488 = vmatprep.subr.bf16.mxu1 %v4611_v61  ;;  %v4648_v31 = vld [vmem:[%s5845_s2 + $0x620] ss:$8 sps:$4 sm:$0xff]   ;;  %v4651_v61 = vld [vmem:[%s5845_s2 + $0x630] ss:$8 sps:$4 sm:$0xff]  }
 0x190   :  { %1703 = vmatpush1.bf16.msra.mxu0 %v4606_v62  ;;  %2489 = vmatpush1.bf16.msra.mxu1 %v4609_v19  ;;  %v4656_v62 = vld [vmem:[%s5845_s2 + $0x644] ss:$8 sps:$4 sm:$0xff]   ;;  %v4654_v19 = vld [vmem:[%s5845_s2 + $0x640] ss:$8 sps:$4 sm:$0xff]  }
 0x191   :  { %2490 = vmatprep.subr.bf16.mxu1 %v4614_v0  ;;  %v4662_v0 = vld [vmem:[%s5845_s2 + $0x664] ss:$8 sps:$4 sm:$0xff]  }
 0x193   :  { %1721 = vmatmul.mubr.bf16.vlgmr.msra.gmra.mrb[64].mxu0 %v5093_v45  ;;  %v4618_v45 = vld [vmem:[%s5845_s2 + $0x580] ss:$8 sps:$4 sm:$0xff]  }
 0x194   :  { %2491 = vmatpush1.bf16.msra.mxu1 %v4612_v28  ;;  %1730 = vmatprep.mubr.bf16.mxu0 %v4744_v49  ;;  %v4674_v28 = vld [vmem:[%s5845_s2 + $0x6a4] ss:$8 sps:$4 sm:$0xff]  }
 0x195   :  { %2492 = vmatprep.subr.bf16.mxu1 %v4617_v13  ;;  %v4680_v13 = vld [vmem:[%s5845_s2 + $0x6c4] ss:$8 sps:$4 sm:$0xff]  }
 0x198   :  { %2493 = vmatpush1.bf16.msra.mxu1 %v4615_v20  ;;  %v4686_v20 = vld [vmem:[%s5845_s2 + $0x6e4] ss:$8 sps:$4 sm:$0xff]  }
 0x199   :  { %2636 = vmatprep.subr.bf16.mxu1 %v4620_v22  ;;  %v4684_v22 = vld [vmem:[%s5845_s2 + $0x6e0] ss:$8 sps:$4 sm:$0xff]  }
 0x19b   :  { %1731 = vmatmul.mubr.bf16.gmra.mrb[68].mxu0 %v5088_v43  ;;  %2511 = vmatmul.mubr.bf16.vlgmr.msra.gmra.mrb[0].mxu1 %v5234_v44  ;;  %v4629_v43 = vld [vmem:[%s5845_s2 + $0x5b4] ss:$8 sps:$4 sm:$0xff]   ;;  %v4627_v44 = vld [vmem:[%s5845_s2 + $0x5b0] ss:$8 sps:$4 sm:$0xff]  }
 0x19c   :  { %2637 = vmatpush1.bf16.msra.mxu1 %v4618_v45  ;;  %2520 = vmatprep.mubr.bf16.mxu1 %v4744_v49  ;;  %v4689_v45 = vld [vmem:[%s5845_s2 + $0x6f4] ss:$8 sps:$4 sm:$0xff]  }
 0x19d   :  { %2638 = vmatprep.subr.bf16.mxu1 %v4623_v23  ;;  %v4687_v23 = vld [vmem:[%s5845_s2 + $0x6f0] ss:$8 sps:$4 sm:$0xff]  }
 0x1a0   :  { %2639 = vmatpush1.bf16.msra.mxu1 %v4621_v24  ;;  %v4692_v24 = vld [vmem:[%s5845_s2 + $0x704] ss:$8 sps:$4 sm:$0xff]  }
 0x1a1   :  { %2640 = vmatprep.subr.bf16.mxu1 %v4626_v26  ;;  %v4690_v26 = vld [vmem:[%s5845_s2 + $0x700] ss:$8 sps:$4 sm:$0xff]  }
 0x1a3   :  { %2521 = vmatmul.mubr.bf16.gmra.mrb[4].mxu1 %v5226_v40  ;;  %v4635_v40 = vld [vmem:[%s5845_s2 + $0x5d4] ss:$8 sps:$4 sm:$0xff]  }
 0x1a4   :  { %2641 = vmatpush1.bf16.msra.mxu1 %v4624_v29  ;;  %2668 = vmatprep.mubr.bf16.mxu1 %v4744_v49  ;;  %v4695_v29 = vld [vmem:[%s5845_s2 + $0x714] ss:$8 sps:$4 sm:$0xff]  }
 0x1a5   :  { %2642 = vmatprep.subr.bf16.mxu1 %v4629_v43  ;;  %v4693_v43 = vld [vmem:[%s5845_s2 + $0x710] ss:$8 sps:$4 sm:$0xff]  }
 0x1a8   :  { %2643 = vmatpush1.bf16.msra.mxu1 %v4627_v44  ;;  %v4698_v44 = vld [vmem:[%s5845_s2 + $0x724] ss:$8 sps:$4 sm:$0xff]  }
 0x1a9   :  { %2644 = vmatprep.subr.bf16.mxu1 %v4632_v30  ;;  %v4696_v30 = vld [vmem:[%s5845_s2 + $0x720] ss:$8 sps:$4 sm:$0xff]  }
 0x1ac   :  { %2645 = vmatpush1.bf16.msra.mxu1 %v4630_v32  ;;  %v4699_v32 = vld [vmem:[%s5845_s2 + $0x730] ss:$8 sps:$4 sm:$0xff]  }
 0x1ad   :  { %2646 = vmatprep.subr.bf16.mxu1 %v4635_v40  ;;  %v4704_v40 = vld [vmem:[%s5845_s2 + $0x744] ss:$8 sps:$4 sm:$0xff]  }
 0x1b0   :  { %2647 = vmatpush1.bf16.msra.mxu1 %v4633_v35  ;;  %v4710_v35 = vld [vmem:[%s5845_s2 + $0x764] ss:$8 sps:$4 sm:$0xff]  }
 0x1b1   :  { %2648 = vmatprep.subr.bf16.mxu1 %v4638_v27  ;;  %v4713_v27 = vld [vmem:[%s5845_s2 + $0x774] ss:$8 sps:$4 sm:$0xff]  }
 0x1b4   :  { %2649 = vmatpush1.bf16.msra.mxu1 %v4636_v52  ;;  %v4723_v52 = vld [vmem:[%s5845_s2 + $0x7b0] ss:$8 sps:$4 sm:$0xff]  }
 0x1b5   :  { %2650 = vmatprep.subr.bf16.mxu1 %v4641_v18  ;;  %v4726_v18 = vld [vmem:[%s5845_s2 + $0x7c0] ss:$8 sps:$4 sm:$0xff]  }
 0x1b8   :  { %2651 = vmatpush1.bf16.msra.mxu1 %v4639_v59  ;;  %v4734_v59 = vld [vmem:[%s5845_s2 + $0x7e4] ss:$8 sps:$4 sm:$0xff]  }
 0x1b9   :  { %2794 = vmatprep.subr.bf16.mxu1 %v4644_v60  ;;  %v4732_v60 = vld [vmem:[%s5845_s2 + $0x7e0] ss:$8 sps:$4 sm:$0xff]  }
 0x1bb   :  { %2669 = vmatmul.mubr.bf16.vlgmr.msra.gmra.mrb[0].mxu1 %v5266_v6  ;;  %v4653_v6 = vld [vmem:[%s5845_s2 + $0x634] ss:$8 sps:$4 sm:$0xff]  }
 0x1bc   :  { %2795 = vmatpush1.bf16.msra.mxu1 %v4642_v51  ;;  %2678 = vmatprep.mubr.bf16.mxu1 %v4744_v49  ;;  %v4737_v51 = vld [vmem:[%s5845_s2 + $0x7f4] ss:$8 sps:$4 sm:$0xff]  }
 0x1bd   :  { %2796 = vmatprep.subr.bf16.mxu1 %v4647_v14  ;;  %v4735_v14 = vld [vmem:[%s5845_s2 + $0x7f0] ss:$8 sps:$4 sm:$0xff]  }
 0x1c0   :  { %2797 = vmatpush1.bf16.msra.mxu1 %v4645_v5 }
 0x1c1   :  { %2798 = vmatprep.subr.bf16.mxu1 %v4650_v58 }
 0x1c3   :  { %2679 = vmatmul.mubr.bf16.gmra.mrb[4].mxu1 %v5258_v2  ;;  %v4659_v2 = vld [vmem:[%s5845_s2 + $0x654] ss:$8 sps:$4 sm:$0xff]  }
 0x1c4   :  { %2799 = vmatpush1.bf16.msra.mxu1 %v4648_v31  ;;  %2826 = vmatprep.mubr.bf16.mxu1 %v4744_v49 }
 0x1c5   :  { %2800 = vmatprep.subr.bf16.mxu1 %v4653_v6 }
 0x1c8   :  { %2801 = vmatpush1.bf16.msra.mxu1 %v4651_v61 }
 0x1c9   :  { %2802 = vmatprep.subr.bf16.mxu1 %v4656_v62 }
 0x1cc   :  { %2803 = vmatpush1.bf16.msra.mxu1 %v4654_v19 }
 0x1cd   :  { %2804 = vmatprep.subr.bf16.mxu1 %v4659_v2 }
 0x1d0   :  { %2805 = vmatpush1.bf16.msra.mxu1 %v4657_v63 }
 0x1d1   :  { %2806 = vmatprep.subr.bf16.mxu1 %v4662_v0 }
 0x1d4   :  { %2807 = vmatpush1.bf16.msra.mxu1 %v4660_v55 }
 0x1d5   :  { %2808 = vmatprep.subr.bf16.mxu1 %v4665_v1 }
 0x1d8   :  { %2809 = vmatpush1.bf16.msra.mxu1 %v4663_v3 }
 0x1d9   :  { %2952 = vmatprep.subr.bf16.mxu1 %v4668_v4 }
 0x1db   :  { %2827 = vmatmul.mubr.bf16.vlgmr.msra.gmra.mrb[0].mxu1 %v5327_v48  ;;  %v4677_v48 = vld [vmem:[%s5845_s2 + $0x6b4] ss:$8 sps:$4 sm:$0xff]  }
 0x1dc   :  { %2953 = vmatpush1.bf16.msra.mxu1 %v4666_v8  ;;  %2836 = vmatprep.mubr.bf16.mxu1 %v4744_v49 }
 0x1dd   :  { %2954 = vmatprep.subr.bf16.mxu1 %v4671_v9 }
 0x1e0   :  { %2955 = vmatpush1.bf16.msra.mxu1 %v4669_v10 }
 0x1e1   :  { %2956 = vmatprep.subr.bf16.mxu1 %v4674_v28 }
 0x1e3   :  { %2837 = vmatmul.mubr.bf16.gmra.mrb[4].mxu1 %v5319_v42  ;;  %v4683_v42 = vld [vmem:[%s5845_s2 + $0x6d4] ss:$8 sps:$4 sm:$0xff]  }
 0x1e4   :  { %2957 = vmatpush1.bf16.msra.mxu1 %v4672_v11  ;;  %2984 = vmatprep.mubr.bf16.mxu1 %v4744_v49 }
 0x1e5   :  { %2958 = vmatprep.subr.bf16.mxu1 %v4677_v48 }
 0x1e8   :  { %2959 = vmatpush1.bf16.msra.mxu1 %v4675_v12 }
 0x1e9   :  { %2960 = vmatprep.subr.bf16.mxu1 %v4680_v13 }
 0x1ec   :  { %2961 = vmatpush1.bf16.msra.mxu1 %v4678_v15 }
 0x1ed   :  { %2962 = vmatprep.subr.bf16.mxu1 %v4683_v42 }
 0x1f0   :  { %2963 = vmatpush1.bf16.msra.mxu1 %v4681_v16 }
 0x1f1   :  { %2964 = vmatprep.subr.bf16.mxu1 %v4686_v20 }
 0x1f4   :  { %2965 = vmatpush1.bf16.msra.mxu1 %v4684_v22 }
 0x1f5   :  { %2966 = vmatprep.subr.bf16.mxu1 %v4689_v45 }
 0x1f8   :  { %2967 = vmatpush1.bf16.msra.mxu1 %v4687_v23 }
 0x1f9   :  { %3110 = vmatprep.subr.bf16.mxu1 %v4692_v24 }
 0x1fb   :  { %2985 = vmatmul.mubr.bf16.vlgmr.msra.gmra.mrb[0].mxu1 %v5435_v37  ;;  %v4701_v37 = vld [vmem:[%s5845_s2 + $0x734] ss:$8 sps:$4 sm:$0xff]  }
 0x1fc   :  { %3111 = vmatpush1.bf16.msra.mxu1 %v4690_v26  ;;  %2994 = vmatprep.mubr.bf16.mxu1 %v4744_v49 }
 0x1fd   :  { %3112 = vmatprep.subr.bf16.mxu1 %v4695_v29 }
 0x200   :  { %3113 = vmatpush1.bf16.msra.mxu1 %v4693_v43 }
 0x201   :  { %3114 = vmatprep.subr.bf16.mxu1 %v4698_v44 }
 0x203   :  { %2995 = vmatmul.mubr.bf16.gmra.mrb[4].mxu1 %v5427_v34  ;;  %v4707_v34 = vld [vmem:[%s5845_s2 + $0x754] ss:$8 sps:$4 sm:$0xff]  }
 0x204   :  { %3115 = vmatpush1.bf16.msra.mxu1 %v4696_v30  ;;  %3142 = vmatprep.mubr.bf16.mxu1 %v4744_v49 }
 0x205   :  { %3116 = vmatprep.subr.bf16.mxu1 %v4701_v37 }
 0x208   :  { %3117 = vmatpush1.bf16.msra.mxu1 %v4699_v32 }
 0x209   :  { %3118 = vmatprep.subr.bf16.mxu1 %v4704_v40 }
 0x20c   :  { %3119 = vmatpush1.bf16.msra.mxu1 %v4702_v53 }
 0x20d   :  { %3120 = vmatprep.subr.bf16.mxu1 %v4707_v34 }
 0x210   :  { %3121 = vmatpush1.bf16.msra.mxu1 %v4705_v33 }
 0x211   :  { %3122 = vmatprep.subr.bf16.mxu1 %v4710_v35 }
 0x214   :  { %3123 = vmatpush1.bf16.msra.mxu1 %v4708_v36 }
 0x215   :  { %3124 = vmatprep.subr.bf16.mxu1 %v4713_v27 }
 0x218   :  { %3125 = vmatpush1.bf16.msra.mxu1 %v4711_v38 }
 0x219   :  { %3268 = vmatprep.subr.bf16.mxu1 %v4716_v39 }
 0x21b   :  { %3143 = vmatmul.mubr.bf16.vlgmr.msra.gmra.mrb[0].mxu1 %v5532_v21  ;;  %v4725_v21 = vld [vmem:[%s5845_s2 + $0x7b4] ss:$8 sps:$4 sm:$0xff]  }
 0x21c   :  { %3269 = vmatpush1.bf16.msra.mxu1 %v4714_v41  ;;  %3152 = vmatprep.mubr.bf16.mxu1 %v4744_v49 }
 0x21d   :  { %3270 = vmatprep.subr.bf16.mxu1 %v4719_v46 }
 0x220   :  { %3271 = vmatpush1.bf16.msra.mxu1 %v4717_v47 }
 0x221   :  { %3272 = vmatprep.subr.bf16.mxu1 %v4722_v7 }
 0x223   :  { %3153 = vmatmul.mubr.bf16.gmra.mrb[4].mxu1 %v5526_v17  ;;  %v4731_v17 = vld [vmem:[%s5845_s2 + $0x7d4] ss:$8 sps:$4 sm:$0xff]  }
 0x224   :  { %3273 = vmatpush1.bf16.msra.mxu1 %v4720_v50  ;;  %3300 = vmatprep.mubr.bf16.mxu1 %v4744_v49 }
 0x225   :  { %3274 = vmatprep.subr.bf16.mxu1 %v4725_v21 }
 0x228   :  { %3275 = vmatpush1.bf16.msra.mxu1 %v4723_v52 }
 0x229   :  { %3276 = vmatprep.subr.bf16.mxu1 %v4728_v25 }
 0x22c   :  { %3277 = vmatpush1.bf16.msra.mxu1 %v4726_v18 }
 0x22d   :  { %3278 = vmatprep.subr.bf16.mxu1 %v4731_v17 }
 0x230   :  { %3279 = vmatpush1.bf16.msra.mxu1 %v4729_v54 }
 0x231   :  { %3280 = vmatprep.subr.bf16.mxu1 %v4734_v59 }
 0x234   :  { %3281 = vmatpush1.bf16.msra.mxu1 %v4732_v60 }
 0x235   :  { %3282 = vmatprep.subr.bf16.mxu1 %v4737_v51 }
 0x238   :  { %3283 = vmatpush1.bf16.msra.mxu1 %v4735_v14 }
 0x23b   :  { %3301 = vmatmul.mubr.bf16.vlgmr.msra.gmra.mrb[0].mxu1 %v5586_v57 }
 0x23c   :  { %3310 = vmatprep.mubr.bf16.mxu1 %v4744_v49 }
 0x243   :  { %3311 = vmatmul.mubr.bf16.gmra.mrb[4].mxu1 %v5584_v56 }
 0x266   :  { %v1722_v5 = vpop.f32.mrb[64].mxu0 }
 0x267   :  { %v1724_v58 = vpop.f32.mrb[65].mxu0 }
 0x268   :  { %v1726_v31 = vpop.f32.mrb[66].mxu0 }
 0x269   :  { %v1728_v6 = vpop.f32.mrb[67].mxu0 }
 0x26e   :  { %v1732_v61 = vpop.f32.mrb[68].mxu0 }
 0x26f   :  { %v1734_v62 = vpop.f32.mrb[69].mxu0 }
 0x270   :  { %v1736_v19 = vpop.f32.mrb[70].mxu0 }
 0x271   :  { %v1738_v2 = vpop.f32.mrb[71].mxu0 }
 0x30e   :  { %v3302_v63 = vpop.f32.mrb[0].mxu1 }
 0x30f   :  { %v4197_v0 = vadd.f32 %v3302_v63, %v1722_v5  ;;  %v3304_v55 = vpop.f32.mrb[1].mxu1 }
 0x310   :  { %v4198_v1 = vadd.f32 %v3304_v55, %v1724_v58  ;;  %v3306_v3 = vpop.f32.mrb[2].mxu1 }
 0x311   :  { %v4199_v4 = vadd.f32 %v3306_v3, %v1726_v31  ;;  %v3308_v8 = vpop.f32.mrb[3].mxu1 }
 0x312   :  { %v4200_v57 = vadd.f32 %v3308_v8, %v1728_v6 }
 0x313   :  { %v3329_v9 = vadd.f32 %v4199_v4, %v4197_v0 }
 0x314   :  { %v3338_v49 = vadd.f32 %v4200_v57, %v4198_v1 }
 0x316   :  { %v3312_v10 = vpop.f32.mrb[4].mxu1 }
 0x317   :  { %v4201_v56 = vadd.f32 %v3312_v10, %v1732_v61  ;;  %v3314_v28 = vpop.f32.mrb[5].mxu1  ;;  %v4745_v10 = vmov 1966171168  }
 0x318   :  { %v4202_v11 = vadd.f32 %v3314_v28, %v1734_v62  ;;  %v3316_v48 = vpop.f32.mrb[6].mxu1  ;;  %v3396_v28 = vlaneseq }
 0x319   :  { %v3330_v12 = vadd.f32 %v4201_v56, %v3329_v9  ;;  %v4203_v13 = vadd.f32 %v3316_v48, %v1736_v19  ;;  %v3318_v15 = vpop.f32.mrb[7].mxu1 }
 0x31a   :  { %v3339_v42 = vadd.f32 %v4202_v11, %v3338_v49  ;;  %v4204_v16 = vadd.f32 %v3318_v15, %v1738_v2  ;;  %v3397_v48 = vshrl.u32 %v3396_v28, 7 }
 0x31b   :  { %v3331_v20 = vadd.f32 %v4203_v13, %v3330_v12 }
 0x31c   :  { %v3340_v22 = vadd.f32 %v4204_v16, %v3339_v42 }
 0x31d   :  { %v3332_v45 = vrot.slane %v3331_v20, 4 }
 0x31e   :  { %v3341_v23 = vrot.slane %v3340_v22, 4 }
 0x31f   :  { %v3333_v24 = vadd.f32 %v3332_v45, %v3331_v20  ;;  %v3385_v20 = vld [vmem:[%s5846_s3] sm:$0x3]  ;;  %v3412_v45 = vsub.s32 0, %v3397_v48 }
 0x320   :  { %v3342_v26 = vadd.f32 %v3341_v23, %v3340_v22  ;;  %v3416_v23 = vsub.s32 1, %v3397_v48 }
 0x321   :  { %v3334_v29 = vrot.slane %v3333_v24, 2 }
 0x322   :  { %v3343_v43 = vrot.slane %v3342_v26, 2 }
 0x323   :  { %v3335_v44 = vadd.f32 %v3334_v29, %v3333_v24  ;;  %v3428_v24 = vld [vmem:[%s5847_s4] sm:$0x3] }
 0x324   :  { %v3344_v30 = vadd.f32 %v3343_v43, %v3342_v26 }
 0x325   :  { %v3336_v37 = vrot.slane %v3335_v44, 1 }
 0x326   :  { %v3345_v32 = vrot.slane %v3344_v30, 1 }
 0x327   :  { %v3337_v40 = vadd.f32 %v3336_v37, %v3335_v44  ;;  %v3437_v44 = vrot.slane %v3428_v24, %v3416_v23 }
 0x328   :  { %v3346_v53 = vadd.f32 %v3345_v32, %v3344_v30  ;;  %v3433_v30 = vrot.slane %v3428_v24, %v3412_v45 }
 0x329   :  { %v3347_v34 = vmul.f32 0.03125, %v3337_v40 }
 0x32a   :  { %v3348_v33 = vmul.f32 0.03125, %v3346_v53 }
 0x32b   :  { %v5802_v35 = vsub.f32 %v4197_v0, %v3347_v34  ;;  %v5804_v36 = vsub.f32 %v4199_v4, %v3347_v34  ;;  %v5806_v27 = vsub.f32 %v4201_v56, %v3347_v34  ;;  %v5808_v38 = vsub.f32 %v4203_v13, %v3347_v34 }
 0x32c   :  { %v3350_v39 = vsub.f32 %v4198_v1, %v3348_v33  ;;  %v3352_v41 = vsub.f32 %v4200_v57, %v3348_v33  ;;  %v3354_v46 = vsub.f32 %v4202_v11, %v3348_v33  ;;  %v3356_v47 = vsub.f32 %v4204_v16, %v3348_v33 }
 0x32d   :  { %v3357_v7 = vmul.f32 %v5802_v35, %v5802_v35  ;;  %v3359_v50 = vmul.f32 %v5804_v36, %v5804_v36  ;;  %v3361_v25 = vmul.f32 %v5806_v27, %v5806_v27  ;;  %v3363_v59 = vmul.f32 %v5808_v38, %v5808_v38 }
 0x32e   :  { %v3358_v21 = vmul.f32 %v3350_v39, %v3350_v39  ;;  %v3360_v52 = vmul.f32 %v3352_v41, %v3352_v41  ;;  %v3362_v17 = vmul.f32 %v3354_v46, %v3354_v46  ;;  %v3364_v51 = vmul.f32 %v3356_v47, %v3356_v47 }
 0x32f   :  { %v3365_v18 = vadd.f32 %v3359_v50, %v3357_v7  ;;  %v3394_v56 = vunpack.c.l.s4 %v4745_v10 }
 0x330   :  { %v3374_v54 = vadd.f32 %v3360_v52, %v3358_v21 }
 0x331   :  { %v3366_v60 = vadd.f32 %v3365_v18, %v3361_v25  ;;  %v3395_v11 = vunpack.c.0.s8 %v3394_v56 }
 0x332   :  { %v3375_v14 = vadd.f32 %v3374_v54, %v3362_v17  ;;  %v3467_v17 = vld [vmem:[%s5848_s5 + $0x18] sm:$0xff] }
 0x333   :  { %v3367_v5 = vadd.f32 %v3366_v60, %v3363_v59  ;;  %v3398_v13 = vsub.s32 %v3395_v11, %v3397_v48 }
 0x334   :  { %v3376_v58 = vadd.f32 %v3375_v14, %v3364_v51 }
 0x335   :  { %v3368_v31 = vrot.slane %v3367_v5, 4 }
 0x336   :  { %v3377_v6 = vrot.slane %v3376_v58, 4 }
 0x337   :  { %v3369_v61 = vadd.f32 %v3368_v31, %v3367_v5  ;;  %v3465_v31 = vld [vmem:[%s5848_s5 + $0x8] sm:$0xff] }
 0x338   :  { %v3378_v62 = vadd.f32 %v3377_v6, %v3376_v58  ;;  %v3466_v6 = vld [vmem:[%s5848_s5 + $0x10] sm:$0xff] }
 0x339   :  { %v3370_v19 = vrot.slane %v3369_v61, 2 }
 0x33a   :  { %v3379_v2 = vrot.slane %v3378_v62, 2 }
 0x33b   :  { %v3371_v63 = vadd.f32 %v3370_v19, %v3369_v61 }
 0x33c   :  { %v3380_v0 = vadd.f32 %v3379_v2, %v3378_v62 }
 0x33d   :  { %v3372_v55 = vrot.slane %v3371_v63, 1 }
 0x33e   :  { %v3381_v1 = vrot.slane %v3380_v0, 1 }
 0x33f   :  { %v3373_v3 = vadd.f32 %v3372_v55, %v3371_v63 }
 0x340   :  { %v3382_v4 = vadd.f32 %v3381_v1, %v3380_v0 }
 0x341   :  { %v3383_v8 = vmul.f32 0.03125, %v3373_v3 }
 0x342   :  { %v3384_v57 = vmul.f32 0.03125, %v3382_v4 }
 0x343   :  { %v3386_v9 = vadd.f32 1e-05, %v3383_v8 }
 0x344   :  { %v3387_v49 = vadd.f32 1e-05, %v3384_v57 }
 0x345   :  { %4738 = vrsqrt.f32 %v3386_v9 }
 0x346   :  { %4740 = vrsqrt.f32 %v3387_v49 }
 0x34f   :  { %v4739_v12 = vpop.eup %4738 }
 0x350   :  { %v4741_v15 = vpop.eup %4740 }
 0x351   :  { %v3392_v42 = vcombine.low %v4739_v12, %v4741_v15 }
 0x353   :  { %v3399_v16 = vrot.slane %v3392_v42, %v3398_v13 }
 0x355   :  { %v3406_v22 = vrot.slane %v3399_v16, %v3398_v13 }
 0x357   :  { %v3408_v26 = vmul.f32 %v3406_v22, %v3385_v20 }
 0x359   :  { %v3413_v29 = vrot.slane %v3408_v26, %v3412_v45  ;;  %v3417_v43 = vrot.slane %v3408_v26, %v3416_v23 }
 0x35b   :  { %v3421_v37 = vmul.f32 %v3417_v43, %v3350_v39  ;;  %v3423_v32 = vmul.f32 %v3417_v43, %v3352_v41  ;;  %v3425_v40 = vmul.f32 %v3417_v43, %v3354_v46  ;;  %v3427_v53 = vmul.f32 %v3417_v43, %v3356_v47 }
 0x35c   :  { %v3420_v34 = vmul.f32 %v3413_v29, %v5802_v35  ;;  %v3422_v33 = vmul.f32 %v3413_v29, %v5804_v36  ;;  %v3424_v7 = vmul.f32 %v3413_v29, %v5806_v27  ;;  %v3426_v50 = vmul.f32 %v3413_v29, %v5808_v38  ;;  %v3464_v36 = vld [vmem:[%s5848_s5] sm:$0xff] }
 0x35d   :  { %v3443_v21 = vadd.f32 %v3437_v44, %v3423_v32  ;;  %v3445_v52 = vadd.f32 %v3437_v44, %v3425_v40  ;;  %v3447_v25 = vadd.f32 %v3437_v44, %v3427_v53  ;;  %v3441_v18 = vadd.f32 %v3437_v44, %v3421_v37 }
 0x35e   :  { %v3440_v39 = vadd.f32 %v3433_v30, %v3420_v34  ;;  %v3442_v41 = vadd.f32 %v3433_v30, %v3422_v33  ;;  %v3444_v46 = vadd.f32 %v3433_v30, %v3424_v7  ;;  %v3446_v47 = vadd.f32 %v3433_v30, %v3426_v50 }
 0x35f   :  { %v3451_v54 = vmul.f32 0.2, %v3443_v21  ;;  %v3455_v35 = vmul.f32 0.2, %v3447_v25  ;;  %v3449_v59 = vmul.f32 0.2, %v3441_v18 }
 0x360   :  { %v3448_v27 = vmul.f32 0.2, %v3440_v39  ;;  %v3450_v38 = vmul.f32 0.2, %v3442_v41  ;;  %v3452_v60 = vmul.f32 0.2, %v3444_v46 }
 0x361   :  { %v3459_v51 = vmax.f32 %v3443_v21, %v3451_v54  ;;  %v3463_v14 = vmax.f32 %v3447_v25, %v3455_v35  ;;  %v3453_v5 = vmul.f32 0.2, %v3445_v52  ;;  %v3454_v58 = vmul.f32 0.2, %v3446_v47 }
 0x362   :  { %v3456_v61 = vmax.f32 %v3440_v39, %v3448_v27  ;;  %v3457_v62 = vmax.f32 %v3441_v18, %v3449_v59  ;;  %v3458_v19 = vmax.f32 %v3442_v41, %v3450_v38  ;;  %v3460_v2 = vmax.f32 %v3444_v46, %v3452_v60 }
 0x363   :  { %v3471_v63 = vmul.f32 %v3467_v17, %v3459_v51  ;;  %v3475_v0 = vmul.f32 %v3467_v17, %v3463_v14  ;;  %v3461_v55 = vmax.f32 %v3445_v52, %v3453_v5  ;;  %v3462_v1 = vmax.f32 %v3446_v47, %v3454_v58 }
 0x364   :  { %v3468_v3 = vmul.f32 %v3464_v36, %v3456_v61  ;;  %v3469_v4 = vmul.f32 %v3465_v31, %v3457_v62  ;;  %v3470_v8 = vmul.f32 %v3466_v6, %v3458_v19  ;;  %v3472_v57 = vmul.f32 %v3464_v36, %v3460_v2 }
 0x365   :  { %v3473_v9 = vmul.f32 %v3465_v31, %v3461_v55  ;;  %v3474_v49 = vmul.f32 %v3466_v6, %v3462_v1 }
 0x366   :  { %v3476_v10 = vadd.f32 %v3470_v8, %v3468_v3  ;;  %v3483_v56 = vadd.f32 %v3471_v63, %v3469_v4 }
 0x367   :  { %v3490_v28 = vadd.f32 %v3474_v49, %v3472_v57  ;;  %v3497_v11 = vadd.f32 %v3475_v0, %v3473_v9 }
 0x368   :  { %v3477_v48 = vrot.slane %v3476_v10, 4  ;;  %v3484_v12 = vrot.slane %v3483_v56, 4 }
 0x369   :  { %v3491_v13 = vrot.slane %v3490_v28, 4  ;;  %v3498_v15 = vrot.slane %v3497_v11, 4 }
 0x36a   :  { %v3478_v42 = vadd.f32 %v3477_v48, %v3476_v10  ;;  %v3485_v16 = vadd.f32 %v3484_v12, %v3483_v56 }
 0x36b   :  { %v3492_v20 = vadd.f32 %v3491_v13, %v3490_v28  ;;  %v3499_v22 = vadd.f32 %v3498_v15, %v3497_v11 }
 0x36c   :  { %v3479_v45 = vrot.slane %v3478_v42, 2  ;;  %v3486_v23 = vrot.slane %v3485_v16, 2 }
 0x36d   :  { %v3493_v24 = vrot.slane %v3492_v20, 2  ;;  %v3500_v26 = vrot.slane %v3499_v22, 2 }
 0x36e   :  { %v3480_v29 = vadd.f32 %v3479_v45, %v3478_v42  ;;  %v3487_v43 = vadd.f32 %v3486_v23, %v3485_v16 }
 0x36f   :  { %v3494_v44 = vadd.f32 %v3493_v24, %v3492_v20  ;;  %v3501_v30 = vadd.f32 %v3500_v26, %v3499_v22 }
 0x370   :  { %v3481_v37 = vrot.slane %v3480_v29, 1  ;;  %v3488_v32 = vrot.slane %v3487_v43, 1 }
 0x371   :  { %v3495_v40 = vrot.slane %v3494_v44, 1  ;;  %v3502_v53 = vrot.slane %v3501_v30, 1 }
 0x372   :  { %v3482_v34 = vadd.f32 %v3481_v37, %v3480_v29  ;;  %v3489_v33 = vadd.f32 %v3488_v32, %v3487_v43 }
 0x373   :  { %v3496_v7 = vadd.f32 %v3495_v40, %v3494_v44  ;;  %v3503_v50 = vadd.f32 %v3502_v53, %v3501_v30 }
 0x375   :  { %v3509_v21 = vsel %vm3508_vm1, %v3496_v7, %v3482_v34  ;;  %v3510_v52 = vsel %vm3508_vm1, %v3503_v50, %v3489_v33 }
 0x376   :  { %v3514_v25 = vsel %vm3513_vm2, %v3509_v21, 0.0  ;;  %v3515_v18 = vsel %vm3513_vm2, %v3510_v52, 0.0 }
 0x377   :  { %v3516_v17 = vadd.f32 %v3515_v18, %v3514_v25 }
 0x379   :  { %3517 = vadd.xlane.f32.xlu0 %v3516_v17 }
 0x406   :  { %v3518_v39 = vpop.xlane.xlu0 %3517 }
 0x407   :  { %v3519_v41 = vmul.f32 0.5, %v3518_v39 }
 0x409   :  { %4742 = vtanh.f32 %v3519_v41 }
 0x413   :  { %v4743_v46 = vpop.eup %4742 }
 0x414   :  { %v3521_v47 = vadd.f32 1.0, %v4743_v46 }
 0x416   :  { %v3522_v54 = vmul.f32 0.5, %v3521_v47 }
 0x418   :  { %3524 = vst.msk [vmem:[%s5849_s6] sm:$0x3] %vm3523_vm3, %v3522_v54 }

</bundles_post_ra>
